<compile_context>
chip_gen: v7x
topology: tpu7x:2x2x1
jax: 0.10.0
libtpu: 0.0.40
codegen_flags: <defaults>
</compile_context>

<pallas_src>
from types import SimpleNamespace

import jax
import jax.numpy as jnp
from jax.experimental import pallas as pl
from jax.experimental.pallas import tpu as pltpu


# 48 MiB scoped VMEM: above the 16 MiB (v5e) / 32 MiB (v6e, v7x) defaults and
# below v7x's 64 MiB physical ceiling; full-array (1, N, N) blocks stay
# double-buffered up to N ~ 1300 on every generation.
_GRAPH_PARAMS = pltpu.CompilerParams(
    dimension_semantics=("parallel",),
    vmem_limit_bytes=48 * 1024 * 1024,
)
# TODO(synk): for N >~ 1500 on v7x (64 MiB physical VMEM) the N x N graph kernels
# should switch to row-tiled BlockSpecs with a two-pass degree computation.


# ----------------------------------------------------------------------------
# Pallas kernels
# ----------------------------------------------------------------------------
def _sqdist_kernel(x_ref, sqc_ref, sqr_ref, o_ref):
    """D2 = ||x_i||^2 + ||x_j||^2 - 2 <x_i, x_j>; bf16 Gram on the MXU."""
    x = x_ref[0]                                             # (N, D) bf16
    g = jax.lax.dot_general(x, x, (((1,), (1,)), ((), ())),
                            preferred_element_type=jnp.float32)   # (N, N) f32 acc
    # norms come in pre-computed (f32): (N,1) column + (1,N) row -> broadcast add
    o_ref[0] = jnp.maximum(sqc_ref[0] + sqr_ref[0] - 2.0 * g, 0.0)


def pairwise_sqdist(feats):
    """feats: (B, N, D) f32 -> squared pairwise distances (B, N, N) f32."""
    b, n, d = feats.shape
    sq = jnp.sum(feats.astype(jnp.float32) ** 2, axis=-1)   # (B, N) exact f32 norms
    x16 = feats.astype(jnp.bfloat16)                         # MXU-native Gram input, half HBM
    return pl.pallas_call(
        _sqdist_kernel,
        out_shape=jax.ShapeDtypeStruct((b, n, n), jnp.float32),
        grid=(b,),
        in_specs=[pl.BlockSpec((1, n, d), lambda i: (i, 0, 0)),
                  pl.BlockSpec((1, n, 1), lambda i: (i, 0, 0)),
                  pl.BlockSpec((1, 1, n), lambda i: (i, 0, 0))],
        out_specs=pl.BlockSpec((1, n, n), lambda i: (i, 0, 0)),
        compiler_params=_GRAPH_PARAMS,
    )(x16, sq[:, :, None], sq[:, None, :])


def _graph_laplacian_kernel(d2_ref, mask_ref, inv_s2_ref, l_ref):
    b = pl.program_id(0)
    inv_s2 = inv_s2_ref[b]                                   # SMEM scalar (1/sigma^2)
    d2 = d2_ref[0]
    # int8 0/1 mask -> f32 in VMEM; affinity W never leaves VMEM / never hits HBM
    w = mask_ref[0].astype(jnp.float32) * jnp.exp(-d2 * inv_s2)
    n = w.shape[0]
    deg_c = jnp.sum(w, axis=1, keepdims=True)                # (N,1) cross-lane reduce
    # W is symmetric -> row-degree == column-degree; compute the (1,N) row on the
    # otherwise-idle MXU instead of a second full N^2 cross-sublane XLU reduce.
    ones_row = jnp.ones((1, n), jnp.float32)
    deg_r = jax.lax.dot_general(ones_row, w, (((1,), (0,)), ((), ())),
                                preferred_element_type=jnp.float32)   # (1, N)
    s = jax.lax.rsqrt(deg_c + 1e-8) * w * jax.lax.rsqrt(deg_r + 1e-8)
    ri = jax.lax.broadcasted_iota(jnp.int32, (n, n), 0)
    ci = jax.lax.broadcasted_iota(jnp.int32, (n, n), 1)
    # L = I - D^-1/2 W D^-1/2 without materializing an f32 identity.
    l_ref[0] = jnp.where(ri == ci, 1.0 - s, -s)


def graph_laplacian(d2, mask_i8, inv_sigma2):
    """Fused masked Gaussian affinity + symmetric normalized Laplacian."""
    b, n, _ = d2.shape
    return pl.pallas_call(
        _graph_laplacian_kernel,
        out_shape=jax.ShapeDtypeStruct((b, n, n), jnp.float32),
        grid=(b,),
        in_specs=[pl.BlockSpec((1, n, n), lambda i: (i, 0, 0)),
                  pl.BlockSpec((1, n, n), lambda i: (i, 0, 0)),
                  pl.BlockSpec(memory_space=pltpu.MemorySpace.SMEM)],
        out_specs=pl.BlockSpec((1, n, n), lambda i: (i, 0, 0)),
        compiler_params=_GRAPH_PARAMS,
    )(d2, mask_i8, inv_sigma2.astype(jnp.float32))


def _fm_prep_kernel(ev_ref, f_ref, o_ref):
    # S = blockdiag(Ex^T, Ey^T) @ [Fx; Fy] = [A; B]  (one MXU push)
    s = jax.lax.dot_general(ev_ref[...], f_ref[...], (((1,), (0,)), ((), ())),
                            preferred_element_type=jnp.float32)       # (2k, D)
    # G = S S^T packs AA^T, AB^T, BA^T, BB^T into one (2k,2k) result / one store
    o_ref[...] = jax.lax.dot_general(s, s, (((1,), (1,)), ((), ())),
                                     preferred_element_type=jnp.float32)


def fm_prep(evecs_x_t, evecs_y_t, feat_x, feat_y):
    """Fused spectral projections + all four k x k Gram products (2 MXU pushes)."""
    kk, n = evecs_x_t.shape
    zero = jnp.zeros((kk, n), jnp.float32)
    ev_blk = jnp.concatenate(
        [jnp.concatenate([evecs_x_t, zero], axis=1),
         jnp.concatenate([zero, evecs_y_t], axis=1)], axis=0)          # (2k, 2N) block-diag
    f_stack = jnp.concatenate([feat_x.astype(jnp.float32),
                               feat_y.astype(jnp.float32)], axis=0)    # (2N, D)
    g = pl.pallas_call(
        _fm_prep_kernel,
        out_shape=jax.ShapeDtypeStruct((2 * kk, 2 * kk), jnp.float32),
    )(ev_blk, f_stack)
    # (A A^T, B A^T, B B^T, A B^T)
    return g[:kk, :kk], g[kk:, :kk], g[kk:, kk:], g[:kk, kk:]


def _surfm_loss_kernel(pq_ref, qp_ref, cc_ref, diff_ref, o_ref):
    pq = pq_ref[...]                                 # (2k, k)  [Cxy; Cyx]
    qp = qp_ref[...]                                 # (k, 2k)  [Cyx | Cxy]
    cc = cc_ref[...]                                 # (k, 2k)  [Cxy | Cyx]
    k2 = pq.shape[0]
    k = k2 // 2
    ri = jax.lax.broadcasted_iota(jnp.int32, (k2, k2), 0)
    ci = jax.lax.broadcasted_iota(jnp.int32, (k2, k2), 1)
    on_diag = ri == ci
    on_blk = (ri < k) == (ci < k)                    # the two diagonal k x k blocks
    # bijectivity: one block matmul; diag blocks are Cxy@Cyx and Cyx@Cxy
    m = jax.lax.dot_general(pq, qp, (((1,), (0,)), ((), ())),
                            preferred_element_type=jnp.float32)
    m = jnp.where(on_diag, m - 1.0, m)
    bij = jnp.sum(jnp.where(on_blk, m * m, 0.0), keepdims=True)
    # orthogonality: one Gram matmul; diag blocks are Cxy^T Cxy and Cyx^T Cyx
    g = jax.lax.dot_general(cc, cc, (((0,), (0,)), ((), ())),
                            preferred_element_type=jnp.float32)
    g = jnp.where(on_diag, g - 1.0, g)
    orth = jnp.sum(jnp.where(on_blk, g * g, 0.0), keepdims=True)
    # Laplacian commutativity: C_ij * (lam_x_j - lam_y_i), both maps fused
    l = pq * diff_ref[...]
    lap = jnp.sum(l * l, keepdims=True)
    # lane-dense (1,128) unmasked store; scalars live in lanes 0..2
    sel = jax.lax.broadcasted_iota(jnp.int32, (1, 128), 1)
    o_ref[...] = jnp.where(sel == 0, bij,
                           jnp.where(sel == 1, orth,
                                     jnp.where(sel == 2, lap, 0.0)))


def surfm_losses(cxy, cyx, evals_x, evals_y):
    cxy = cxy.astype(jnp.float32)
    cyx = cyx.astype(jnp.float32)
    ex = evals_x.astype(jnp.float32)
    ey = evals_y.astype(jnp.float32)
    pq = jnp.concatenate([cxy, cyx], axis=0)                          # (2k, k)
    qp = jnp.concatenate([cyx, cxy], axis=1)                          # (k, 2k)
    cc = jnp.concatenate([cxy, cyx], axis=1)                          # (k, 2k)
    diff = jnp.concatenate([ex[None, :] - ey[:, None],
                            ey[None, :] - ex[:, None]], axis=0)       # (2k, k)
    packed = pl.pallas_call(
        _surfm_loss_kernel,
        out_shape=jax.ShapeDtypeStruct((1, 128), jnp.float32),
    )(pq, qp, cc, diff)
    return packed[0, 0], packed[0, 1], packed[0, 2]


# ----------------------------------------------------------------------------
# JAX glue reproducing the referenced (external) functions
# ----------------------------------------------------------------------------
def _resolvent_mask(evals_x, evals_y, gamma):
    scaling = jnp.maximum(jnp.max(evals_x), jnp.max(evals_y))
    e1 = jnp.maximum(evals_x / scaling, 0.0)
    e2 = jnp.maximum(evals_y / scaling, 0.0)
    g1 = jnp.power(e1, gamma)[None, :]
    g2 = jnp.power(e2, gamma)[:, None]
    m_re = g2 / (g2 ** 2 + 1.0) - g1 / (g1 ** 2 + 1.0)
    m_im = 1.0 / (g2 ** 2 + 1.0) - 1.0 / (g1 ** 2 + 1.0)
    return m_re ** 2 + m_im ** 2


def _regularized_fm_half(a_at, b_at, evals_x, evals_y, lam, gamma):
    """Rows of C solve (A A^T + lam*diag(D_i)) c_i = (B A^T)_i  (RegularizedFMNet)."""
    d = _resolvent_mask(evals_x, evals_y, gamma)
    mats = a_at[None, :, :] + lam * jax.vmap(jnp.diag)(d)             # (k, k, k)
    # TODO(synk): k batched k x k linear solves have no clean Pallas primitive; XLA solve is used.
    rows = jnp.linalg.solve(mats, b_at[:, :, None])[:, :, 0]
    return rows


def proj_loss_forward(cfg, feat_v, feat_t, w_bij=1.0, w_orth=1.0, w_lap=1e-3,
                      lam=100.0, gamma=0.5):
    k = cfg.laplacian_mat.k
    knn = cfg.knn_graph.k

    # stack the two independent latent graphs -> one batched Pallas pipeline
    feats = jnp.stack([feat_v, feat_t], axis=0).astype(jnp.float32)   # (2, N, D)
    n = feats.shape[1]

    # TODO(synk): reference `Latent_knn_graph_construct` is not provided; standard latent-space
    # kNN graph with self-tuned Gaussian affinity and union-symmetrization is implemented.
    d2 = pairwise_sqdist(feats)                                       # Pallas (batched, bf16 Gram)
    d2_noself = d2 + (jnp.eye(n, dtype=jnp.float32) * 1e10)[None]
    _, idx = jax.lax.top_k(-d2_noself, knn)                           # nearest neighbours (no Pallas top-k)
    hits = jnp.sum(jax.nn.one_hot(idx, n, dtype=jnp.int32), axis=2) > 0
    mask = jnp.logical_or(hits, jnp.swapaxes(hits, 1, 2)).astype(jnp.int8)  # int8: 4x less HBM into kernel
    knn_d2 = jnp.take_along_axis(d2_noself, idx, axis=2)
    inv_sigma2 = (1.0 / (jnp.mean(knn_d2, axis=(1, 2)) + 1e-8))       # (2,) scalars -> SMEM

    L = graph_laplacian(d2, mask, inv_sigma2)                         # Pallas fused affinity+Laplacian

    # TODO(synk): dense symmetric eigendecomposition has no Pallas equivalent; XLA eigh is used.
    L = 0.5 * (L + jnp.swapaxes(L, 1, 2))
    vals, vecs = jnp.linalg.eigh(L)                                   # ascending, batched over 2 graphs
    vecs = jax.lax.stop_gradient(vecs[:, :, :k])                      # .detach() in the reference
    vals = jax.lax.stop_gradient(vals[:, :k])
    v_vals, t_vals = vals[0], vals[1]
    v_vecs_t, t_vecs_t = vecs[0].T, vecs[1].T                         # (k, N): MXU-ready LHS

    # RegularizedFMNet: fused spectral projection + Gram products, then tiny solves
    a_at, b_at, b_bt, a_bt = fm_prep(v_vecs_t, t_vecs_t, feat_v, feat_t)
    Cxy = _regularized_fm_half(a_at, b_at, v_vals, t_vals, lam, gamma)
    Cyx = _regularized_fm_half(b_bt, a_bt, t_vals, v_vals, lam, gamma)

    l_bij, l_orth, l_lap = surfm_losses(Cxy, Cyx, v_vals, t_vals)     # fused Pallas loss (2 MXU pushes)
    # TODO(synk): SURFMNetLoss weights are not specified by the reference; standard defaults used.
    loss_dict = {
        "l_bij": w_bij * l_bij,
        "l_orth": w_orth * l_orth,
        "l_lap": w_lap * l_lap,
    }
    loss_dict["l_total"] = loss_dict["l_bij"] + loss_dict["l_orth"] + loss_dict["l_lap"]
    return loss_dict


# ----------------------------------------------------------------------------
if __name__ == "__main__":
    cfg = SimpleNamespace(
        laplacian_mat=SimpleNamespace(k=8),   # number of Laplacian eigenpairs
        knn_graph=SimpleNamespace(k=4),       # kNN neighbours for the latent graph
    )
    key = jax.random.PRNGKey(0)
    kv, kt = jax.random.split(key)
    N, D = 16, 32                             # nodes x channels (feat_v / feat_t)
    feat_v = jax.random.normal(kv, (N, D), dtype=jnp.float32)
    feat_t = jax.random.normal(kt, (N, D), dtype=jnp.float32)

    loss_fn = jax.jit(lambda fv, ft: proj_loss_forward(cfg, fv, ft))
    out = jax.block_until_ready(loss_fn(feat_v, feat_t))
    for name, val in out.items():
        assert bool(jnp.isfinite(val)), f"non-finite loss term {name}"
    print("KERNEL_OK")
</pallas_src>

<mosaic_0001>
module attributes {stable_mosaic.version = 11 : i64} {
  func.func @_sqdist_kernel(%arg0: i32, %arg1: memref<1x16x32xbf16, #tpu.memory_space<vmem>>, %arg2: memref<1x16x1xf32, #tpu.memory_space<vmem>>, %arg3: memref<1x1x16xf32, #tpu.memory_space<vmem>>, %arg4: memref<1x16x16xf32, #tpu.memory_space<vmem>>) attributes {dimension_semantics = [#tpu.dimension_semantics<parallel>], iteration_bounds = array<i64: 2>, scalar_prefetch = 0 : i64, scratch_operands = 0 : i64, tpu.core_type = #tpu.core_type<tc>, window_params = [{transform_indices = @transform_0, window_bounds = array<i64: 1, 16, 32>}, {transform_indices = @transform_1, window_bounds = array<i64: 1, 16, 1>}, {transform_indices = @transform_2, window_bounds = array<i64: 1, 1, 16>}, {transform_indices = @transform_3, window_bounds = array<i64: 1, 16, 16>}]} {
    %c0 = arith.constant 0 : index
    %c0_0 = arith.constant 0 : index
    %c0_1 = arith.constant 0 : index
    %0 = vector.load %arg1[%c0, %c0_0, %c0_1] : memref<1x16x32xbf16, #tpu.memory_space<vmem>>, vector<1x16x32xbf16>
    %1 = vector.shape_cast %0 : vector<1x16x32xbf16> to vector<16x32xbf16>
    %cst = arith.constant dense<0.000000e+00> : vector<16x16xf32>
    %2 = tpu.matmul %1, %1, %cst {dimension_numbers = #tpu.dot_dimension_numbers<[1], [1], [0], [0], [0, 0, 1, 0], [], []>} : vector<16x32xbf16>, vector<16x32xbf16>, vector<16x16xf32> -> vector<16x16xf32>
    %c0_2 = arith.constant 0 : index
    %c0_3 = arith.constant 0 : index
    %c0_4 = arith.constant 0 : index
    %3 = vector.load %arg2[%c0_2, %c0_3, %c0_4] : memref<1x16x1xf32, #tpu.memory_space<vmem>>, vector<1x16x1xf32>
    %4 = vector.shape_cast %3 : vector<1x16x1xf32> to vector<16x1xf32>
    %c0_5 = arith.constant 0 : index
    %c0_6 = arith.constant 0 : index
    %c0_7 = arith.constant 0 : index
    %5 = vector.load %arg3[%c0_5, %c0_6, %c0_7] : memref<1x1x16xf32, #tpu.memory_space<vmem>>, vector<1x1x16xf32>
    %6 = vector.shape_cast %5 : vector<1x1x16xf32> to vector<1x16xf32>
    %7 = vector.broadcast %4 : vector<16x1xf32> to vector<16x16xf32>
    %8 = vector.broadcast %6 : vector<1x16xf32> to vector<16x16xf32>
    %9 = arith.addf %7, %8 : vector<16x16xf32>
    %cst_8 = arith.constant 2.000000e+00 : f32
    %10 = vector.broadcast %cst_8 : f32 to vector<16x16xf32>
    %11 = arith.mulf %10, %2 : vector<16x16xf32>
    %12 = arith.subf %9, %11 : vector<16x16xf32>
    %cst_9 = arith.constant 0.000000e+00 : f32
    %13 = vector.broadcast %cst_9 : f32 to vector<16x16xf32>
    %14 = arith.maximumf %12, %13 : vector<16x16xf32>
    %c0_10 = arith.constant 0 : index
    %c0_11 = arith.constant 0 : index
    %c0_12 = arith.constant 0 : index
    %15 = vector.load %arg4[%c0_10, %c0_11, %c0_12] : memref<1x16x16xf32, #tpu.memory_space<vmem>>, vector<1x16x16xf32>
    %16 = vector.shape_cast %15 : vector<1x16x16xf32> to vector<16x16xf32>
    %17 = vector.shape_cast %14 : vector<16x16xf32> to vector<1x16x16xf32>
    tpu.vector_store %arg4[%c0_10, %c0_11, %c0_12], %17 {strides = array<i32>} : memref<1x16x16xf32, #tpu.memory_space<vmem>>, vector<1x16x16xf32>,
    return
  }
  func.func @transform_0(%arg0: i32) -> (i32, i32, i32) {
    %c0_i32 = arith.constant 0 : i32
    %c0_i32_0 = arith.constant 0 : i32
    %c0_i32_1 = arith.constant 0 : i32
    return %arg0, %c0_i32, %c0_i32_0 : i32, i32, i32
  }
  func.func @transform_1(%arg0: i32) -> (i32, i32, i32) {
    %c0_i32 = arith.constant 0 : i32
    %c0_i32_0 = arith.constant 0 : i32
    %c0_i32_1 = arith.constant 0 : i32
    return %arg0, %c0_i32, %c0_i32_0 : i32, i32, i32
  }
  func.func @transform_2(%arg0: i32) -> (i32, i32, i32) {
    %c0_i32 = arith.constant 0 : i32
    %c0_i32_0 = arith.constant 0 : i32
    %c0_i32_1 = arith.constant 0 : i32
    return %arg0, %c0_i32, %c0_i32_0 : i32, i32, i32
  }
  func.func @transform_3(%arg0: i32) -> (i32, i32, i32) {
    %c0_i32 = arith.constant 0 : i32
    %c0_i32_0 = arith.constant 0 : i32
    %c0_i32_1 = arith.constant 0 : i32
    return %arg0, %c0_i32, %c0_i32_0 : i32, i32, i32
  }
}

module attributes {stable_mosaic.version = 11 : i64} {
  func.func @_graph_laplacian_kernel(%arg0: i32, %arg1: memref<1x16x16xf32, #tpu.memory_space<vmem>>, %arg2: memref<1x16x16xi8, #tpu.memory_space<vmem>>, %arg3: memref<2xf32, #tpu.memory_space<smem>>, %arg4: memref<1x16x16xf32, #tpu.memory_space<vmem>>) attributes {dimension_semantics = [#tpu.dimension_semantics<parallel>], iteration_bounds = array<i64: 2>, scalar_prefetch = 0 : i64, scratch_operands = 0 : i64, tpu.core_type = #tpu.core_type<tc>, window_params = [{transform_indices = @transform_0, window_bounds = array<i64: 1, 16, 16>}, {transform_indices = @transform_1, window_bounds = array<i64: 1, 16, 16>}, {transform_indices = @transform_2, window_bounds = array<i64: 2>}, {transform_indices = @transform_3, window_bounds = array<i64: 1, 16, 16>}]} {
    %0 = arith.index_cast %arg0 : i32 to index
    %1 = memref.load %arg3[%0] : memref<2xf32, #tpu.memory_space<smem>>
    %c0 = arith.constant 0 : index
    %c0_0 = arith.constant 0 : index
    %c0_1 = arith.constant 0 : index
    %2 = vector.load %arg1[%c0, %c0_0, %c0_1] : memref<1x16x16xf32, #tpu.memory_space<vmem>>, vector<1x16x16xf32>
    %3 = vector.shape_cast %2 : vector<1x16x16xf32> to vector<16x16xf32>
    %c0_2 = arith.constant 0 : index
    %c0_3 = arith.constant 0 : index
    %c0_4 = arith.constant 0 : index
    %4 = vector.load %arg2[%c0_2, %c0_3, %c0_4] : memref<1x16x16xi8, #tpu.memory_space<vmem>>, vector<1x16x16xi8>
    %5 = vector.shape_cast %4 : vector<1x16x16xi8> to vector<16x16xi8>
    %6 = arith.sitofp %5 : vector<16x16xi8> to vector<16x16xf32>
    %cst = arith.constant 0.000000e+00 : f32
    %7 = vector.broadcast %cst : f32 to vector<16x16xf32>
    %8 = arith.subf %7, %3 : vector<16x16xf32>
    %9 = vector.broadcast %1 : f32 to vector<16x16xf32>
    %10 = arith.mulf %8, %9 : vector<16x16xf32>
    %11 = math.exp %10 : vector<16x16xf32>
    %12 = arith.mulf %6, %11 : vector<16x16xf32>
    %cst_5 = arith.constant dense<0.000000e+00> : vector<16xf32>
    %13 = vector.multi_reduction <add>, %12, %cst_5 [1] : vector<16x16xf32> to vector<16xf32>
    %14 = vector.shape_cast %13 : vector<16xf32> to vector<16x1xf32>
    %cst_6 = arith.constant 1.000000e+00 : f32
    %15 = vector.broadcast %cst_6 : f32 to vector<1x16xf32>
    %cst_7 = arith.constant dense<0.000000e+00> : vector<1x16xf32>
    %16 = tpu.matmul %15, %12, %cst_7 {dimension_numbers = #tpu.dot_dimension_numbers<[1], [0], [0], [1], [0, 0, 1, 1], [], []>} : vector<1x16xf32>, vector<16x16xf32>, vector<1x16xf32> -> vector<1x16xf32>
    %cst_8 = arith.constant 9.99999993E-9 : f32
    %17 = vector.broadcast %cst_8 : f32 to vector<16x1xf32>
    %18 = arith.addf %14, %17 : vector<16x1xf32>
    %19 = math.rsqrt %18 : vector<16x1xf32>
    %20 = vector.broadcast %19 : vector<16x1xf32> to vector<16x16xf32>
    %21 = arith.mulf %20, %12 : vector<16x16xf32>
    %cst_9 = arith.constant 9.99999993E-9 : f32
    %22 = vector.broadcast %cst_9 : f32 to vector<1x16xf32>
    %23 = arith.addf %16, %22 : vector<1x16xf32>
    %24 = math.rsqrt %23 : vector<1x16xf32>
    %25 = vector.broadcast %24 : vector<1x16xf32> to vector<16x16xf32>
    %26 = arith.mulf %21, %25 : vector<16x16xf32>
    %27 = tpu.iota {dimensions = array<i32: 0>} : vector<16x16xi32>
    %28 = tpu.iota {dimensions = array<i32: 1>} : vector<16x16xi32>
    %29 = arith.cmpi eq, %27, %28 : vector<16x16xi32>
    %cst_10 = arith.constant 1.000000e+00 : f32
    %30 = vector.broadcast %cst_10 : f32 to vector<16x16xf32>
    %31 = arith.subf %30, %26 : vector<16x16xf32>
    %cst_11 = arith.constant 0.000000e+00 : f32
    %32 = vector.broadcast %cst_11 : f32 to vector<16x16xf32>
    %33 = arith.subf %32, %26 : vector<16x16xf32>
    %34 = arith.select %29, %31, %33 : vector<16x16xi1>, vector<16x16xf32>
    %c0_12 = arith.constant 0 : index
    %c0_13 = arith.constant 0 : index
    %c0_14 = arith.constant 0 : index
    %35 = vector.load %arg4[%c0_12, %c0_13, %c0_14] : memref<1x16x16xf32, #tpu.memory_space<vmem>>, vector<1x16x16xf32>
    %36 = vector.shape_cast %35 : vector<1x16x16xf32> to vector<16x16xf32>
    %37 = vector.shape_cast %34 : vector<16x16xf32> to vector<1x16x16xf32>
    tpu.vector_store %arg4[%c0_12, %c0_13, %c0_14], %37 {strides = array<i32>} : memref<1x16x16xf32, #tpu.memory_space<vmem>>, vector<1x16x16xf32>,
    return
  }
  func.func @transform_0(%arg0: i32) -> (i32, i32, i32) {
    %c0_i32 = arith.constant 0 : i32
    %c0_i32_0 = arith.constant 0 : i32
    %c0_i32_1 = arith.constant 0 : i32
    return %arg0, %c0_i32, %c0_i32_0 : i32, i32, i32
  }
  func.func @transform_1(%arg0: i32) -> (i32, i32, i32) {
    %c0_i32 = arith.constant 0 : i32
    %c0_i32_0 = arith.constant 0 : i32
    %c0_i32_1 = arith.constant 0 : i32
    return %arg0, %c0_i32, %c0_i32_0 : i32, i32, i32
  }
  func.func @transform_2(%arg0: i32) -> i32 {
    %c0_i32 = arith.constant 0 : i32
    %c0_i32_0 = arith.constant 0 : i32
    return %c0_i32 : i32
  }
  func.func @transform_3(%arg0: i32) -> (i32, i32, i32) {
    %c0_i32 = arith.constant 0 : i32
    %c0_i32_0 = arith.constant 0 : i32
    %c0_i32_1 = arith.constant 0 : i32
    return %arg0, %c0_i32, %c0_i32_0 : i32, i32, i32
  }
}

module attributes {stable_mosaic.version = 11 : i64} {
  func.func @_fm_prep_kernel(%arg0: memref<16x32xf32, #tpu.memory_space<vmem>>, %arg1: memref<32x32xf32, #tpu.memory_space<vmem>>, %arg2: memref<16x16xf32, #tpu.memory_space<vmem>>) attributes {dimension_semantics = [], scalar_prefetch = 0 : i64, scratch_operands = 0 : i64, tpu.core_type = #tpu.core_type<tc>} {
    %c0 = arith.constant 0 : index
    %c0_0 = arith.constant 0 : index
    %0 = vector.load %arg0[%c0, %c0_0] : memref<16x32xf32, #tpu.memory_space<vmem>>, vector<16x32xf32>
    %c0_1 = arith.constant 0 : index
    %c0_2 = arith.constant 0 : index
    %1 = vector.load %arg1[%c0_1, %c0_2] : memref<32x32xf32, #tpu.memory_space<vmem>>, vector<32x32xf32>
    %cst = arith.constant dense<0.000000e+00> : vector<16x32xf32>
    %2 = tpu.matmul %0, %1, %cst {dimension_numbers = #tpu.dot_dimension_numbers<[1], [0], [0], [1], [0, 0, 1, 1], [], []>} : vector<16x32xf32>, vector<32x32xf32>, vector<16x32xf32> -> vector<16x32xf32>
    %cst_3 = arith.constant dense<0.000000e+00> : vector<16x16xf32>
    %3 = tpu.matmul %2, %2, %cst_3 {dimension_numbers = #tpu.dot_dimension_numbers<[1], [1], [0], [0], [0, 0, 1, 0], [], []>} : vector<16x32xf32>, vector<16x32xf32>, vector<16x16xf32> -> vector<16x16xf32>
    %c0_4 = arith.constant 0 : index
    %c0_5 = arith.constant 0 : index
    %4 = vector.load %arg2[%c0_4, %c0_5] : memref<16x16xf32, #tpu.memory_space<vmem>>, vector<16x16xf32>
    tpu.vector_store %arg2[%c0_4, %c0_5], %3 {strides = array<i32>} : memref<16x16xf32, #tpu.memory_space<vmem>>, vector<16x16xf32>,
    return
  }
}

module attributes {stable_mosaic.version = 11 : i64} {
  func.func @_surfm_loss_kernel(%arg0: memref<16x8xf32, #tpu.memory_space<vmem>>, %arg1: memref<8x16xf32, #tpu.memory_space<vmem>>, %arg2: memref<8x16xf32, #tpu.memory_space<vmem>>, %arg3: memref<16x8xf32, #tpu.memory_space<vmem>>, %arg4: memref<1x128xf32, #tpu.memory_space<vmem>>) attributes {dimension_semantics = [], scalar_prefetch = 0 : i64, scratch_operands = 0 : i64, tpu.core_type = #tpu.core_type<tc>} {
    %c0 = arith.constant 0 : index
    %c0_0 = arith.constant 0 : index
    %0 = vector.load %arg0[%c0, %c0_0] : memref<16x8xf32, #tpu.memory_space<vmem>>, vector<16x8xf32>
    %c0_1 = arith.constant 0 : index
    %c0_2 = arith.constant 0 : index
    %1 = vector.load %arg1[%c0_1, %c0_2] : memref<8x16xf32, #tpu.memory_space<vmem>>, vector<8x16xf32>
    %c0_3 = arith.constant 0 : index
    %c0_4 = arith.constant 0 : index
    %2 = vector.load %arg2[%c0_3, %c0_4] : memref<8x16xf32, #tpu.memory_space<vmem>>, vector<8x16xf32>
    %3 = tpu.iota {dimensions = array<i32: 0>} : vector<16x16xi32>
    %4 = tpu.iota {dimensions = array<i32: 1>} : vector<16x16xi32>
    %5 = arith.cmpi eq, %3, %4 : vector<16x16xi32>
    %c8_i32 = arith.constant 8 : i32
    %6 = vector.broadcast %c8_i32 : i32 to vector<16x16xi32>
    %7 = arith.cmpi slt, %3, %6 : vector<16x16xi32>
    %c8_i32_5 = arith.constant 8 : i32
    %8 = vector.broadcast %c8_i32_5 : i32 to vector<16x16xi32>
    %9 = arith.cmpi slt, %4, %8 : vector<16x16xi32>
    %10 = arith.xori %7, %9 : vector<16x16xi1>
    %cst = arith.constant dense<true> : vector<16x16xi1>
    %11 = arith.xori %10, %cst : vector<16x16xi1>
    %cst_6 = arith.constant dense<0.000000e+00> : vector<16x16xf32>
    %12 = tpu.matmul %0, %1, %cst_6 {dimension_numbers = #tpu.dot_dimension_numbers<[1], [0], [0], [1], [0, 0, 1, 1], [], []>} : vector<16x8xf32>, vector<8x16xf32>, vector<16x16xf32> -> vector<16x16xf32>
    %cst_7 = arith.constant 1.000000e+00 : f32
    %13 = vector.broadcast %cst_7 : f32 to vector<16x16xf32>
    %14 = arith.subf %12, %13 : vector<16x16xf32>
    %15 = arith.select %5, %14, %12 : vector<16x16xi1>, vector<16x16xf32>
    %16 = arith.mulf %15, %15 : vector<16x16xf32>
    %cst_8 = arith.constant 0.000000e+00 : f32
    %17 = vector.broadcast %cst_8 : f32 to vector<16x16xf32>
    %18 = arith.select %11, %16, %17 : vector<16x16xi1>, vector<16x16xf32>
    %19 = vector.shape_cast %18 : vector<16x16xf32> to vector<1x16x16xf32>
    %cst_9 = arith.constant dense<0.000000e+00> : vector<1xf32>
    %20 = vector.multi_reduction <add>, %19, %cst_9 [1, 2] : vector<1x16x16xf32> to vector<1xf32>
    %21 = vector.shape_cast %20 : vector<1xf32> to vector<1x1x1xf32>
    %22 = vector.extract %21[0, 0, 0] : f32 from vector<1x1x1xf32>
    %23 = vector.broadcast %22 : f32 to vector<1x1xf32>
    %cst_10 = arith.constant dense<0.000000e+00> : vector<16x16xf32>
    %24 = tpu.matmul %2, %2, %cst_10 {dimension_numbers = #tpu.dot_dimension_numbers<[0], [0], [1], [1], [0, 1, 1, 1], [], []>} : vector<8x16xf32>, vector<8x16xf32>, vector<16x16xf32> -> vector<16x16xf32>
    %cst_11 = arith.constant 1.000000e+00 : f32
    %25 = vector.broadcast %cst_11 : f32 to vector<16x16xf32>
    %26 = arith.subf %24, %25 : vector<16x16xf32>
    %27 = arith.select %5, %26, %24 : vector<16x16xi1>, vector<16x16xf32>
    %28 = arith.mulf %27, %27 : vector<16x16xf32>
    %cst_12 = arith.constant 0.000000e+00 : f32
    %29 = vector.broadcast %cst_12 : f32 to vector<16x16xf32>
    %30 = arith.select %11, %28, %29 : vector<16x16xi1>, vector<16x16xf32>
    %31 = vector.shape_cast %30 : vector<16x16xf32> to vector<1x16x16xf32>
    %cst_13 = arith.constant dense<0.000000e+00> : vector<1xf32>
    %32 = vector.multi_reduction <add>, %31, %cst_13 [1, 2] : vector<1x16x16xf32> to vector<1xf32>
    %33 = vector.shape_cast %32 : vector<1xf32> to vector<1x1x1xf32>
    %34 = vector.extract %33[0, 0, 0] : f32 from vector<1x1x1xf32>
    %35 = vector.broadcast %34 : f32 to vector<1x1xf32>
    %c0_14 = arith.constant 0 : index
    %c0_15 = arith.constant 0 : index
    %36 = vector.load %arg3[%c0_14, %c0_15] : memref<16x8xf32, #tpu.memory_space<vmem>>, vector<16x8xf32>
    %37 = arith.mulf %0, %36 : vector<16x8xf32>
    %38 = arith.mulf %37, %37 : vector<16x8xf32>
    %39 = vector.shape_cast %38 : vector<16x8xf32> to vector<1x16x8xf32>
    %cst_16 = arith.constant dense<0.000000e+00> : vector<1xf32>
    %40 = vector.multi_reduction <add>, %39, %cst_16 [1, 2] : vector<1x16x8xf32> to vector<1xf32>
    %41 = vector.shape_cast %40 : vector<1xf32> to vector<1x1x1xf32>
    %42 = vector.extract %41[0, 0, 0] : f32 from vector<1x1x1xf32>
    %43 = vector.broadcast %42 : f32 to vector<1x1xf32>
    %44 = tpu.iota {dimensions = array<i32: 1>} : vector<1x128xi32>
    %c0_i32 = arith.constant 0 : i32
    %45 = vector.broadcast %c0_i32 : i32 to vector<1x128xi32>
    %46 = arith.cmpi eq, %44, %45 : vector<1x128xi32>
    %c1_i32 = arith.constant 1 : i32
    %47 = vector.broadcast %c1_i32 : i32 to vector<1x128xi32>
    %48 = arith.cmpi eq, %44, %47 : vector<1x128xi32>
    %c2_i32 = arith.constant 2 : i32
    %49 = vector.broadcast %c2_i32 : i32 to vector<1x128xi32>
    %50 = arith.cmpi eq, %44, %49 : vector<1x128xi32>
    %cst_17 = arith.constant 0.000000e+00 : f32
    %51 = vector.shape_cast %43 : vector<1x1xf32> to vector<1x1xf32>
    %52 = vector.broadcast %51 : vector<1x1xf32> to vector<1x128xf32>
    %53 = vector.broadcast %cst_17 : f32 to vector<1x128xf32>
    %54 = arith.select %50, %52, %53 : vector<1x128xi1>, vector<1x128xf32>
    %55 = vector.shape_cast %35 : vector<1x1xf32> to vector<1x1xf32>
    %56 = vector.broadcast %55 : vector<1x1xf32> to vector<1x128xf32>
    %57 = arith.select %48, %56, %54 : vector<1x128xi1>, vector<1x128xf32>
    %58 = vector.shape_cast %23 : vector<1x1xf32> to vector<1x1xf32>
    %59 = vector.broadcast %58 : vector<1x1xf32> to vector<1x128xf32>
    %60 = arith.select %46, %59, %57 : vector<1x128xi1>, vector<1x128xf32>
    %c0_18 = arith.constant 0 : index
    %c0_19 = arith.constant 0 : index
    %61 = vector.load %arg4[%c0_18, %c0_19] : memref<1x128xf32, #tpu.memory_space<vmem>>, vector<1x128xf32>
    tpu.vector_store %arg4[%c0_18, %c0_19], %60 {strides = array<i32>} : memref<1x128xf32, #tpu.memory_space<vmem>>, vector<1x128xf32>,
    return
  }
}

</mosaic_0001>

<bundles_post_ra>
// kernel: _lambda_.4
= control target key start
LH: loop header
LB: loop body
LE: loop exit
PB: predicated region body
PF: predicated region fallthrough
CT: control target
= control target key end

     0   :  { %s435_s12 = smov 0   ;;  %s463_s0 = inlined_call_operand.vmem [shape: bf16[2,16,32], index: 0, kind: input, shape index: {}]   ;;  %s464_s1 = inlined_call_operand.vmem [shape: f32[2,16,1], index: 1, kind: input, shape index: {}]   ;;  %s465_s2 = inlined_call_operand.vmem [shape: f32[2,1,16], index: 2, kind: input, shape index: {}]   ;;  %s466_s3 = inlined_call_operand.vmem [shape: f32[2,16,16], index: 3, kind: output, shape index: {}]  }
   0x1 LB: > { %s364_s13 = sadd.s32 4294967295, %s410_s12   ;;  %p368_p0 = scmp.ge.s32.totalorder %s410_s12, 1  ;;  %s410_s12 = sphi %s435_s12, %s13_s12  }
   0x2   : > { %p155_p1 = scmp.lt.s32.totalorder %s410_s12, 3 }
   0x4   : > { %p156_p2 = pnand %p368_p0, %p155_p1 }
   0x5   : > { %p187_p3 = scmp.lt.s32.totalorder (!%p156_p2), %s364_s13, 1  ;;  %v412_v0 = vmov (!%p156_p2), 0.0   ;;  %vm413_vm0 = vmmov (!%p156_p2), 0   ;;  %v414_v1 = vmov (!%p156_p2), 0   ;;  %vm213_vm1 = vcmask (!%p156_p2), 261120  }
   0x6   : > { %159 = sbr.rel (%p156_p2) target bundleno = 246 (0xf6), region = 32  ;;  %385 = vmatprep.subr.bf16.mxu0 (!%p156_p2), %v412_v0  ;;  %387 = vmatprep.mubr.msk.bf16.mxu0 (!%p156_p2), %vm413_vm0, %v412_v0  ;;  %vm285_vm2 = vcmask (!%p156_p2), 130048  }
   0x7   : > { %402 = vset.pattern.permute.xlu0 (!%p156_p2), %v414_v1 }
   0xd   : > { %s468_s13 = smov (!%p187_p3, %s364_s13), 1 }
   0xe   : > { %s380_s14 = sshll.u32 %s468_s13, 3  ;;  %s381_s15 = sshll.u32 %s468_s13, 4 }
   0xf   : > { %s191_s18 = scalar_lea.vmem %s463_s0, %s380_s14  ;;  %s196_s21 = scalar_lea.vmem %s464_s1, %s381_s15 }
  0x10   : > { %v403_v2 = vld [vmem:[%s191_s18] sm:$0xff]   ;;  %v259_v5 = vld [vmem:[%s196_s21 + $0x8] sm:$0xff]  ;;  %s199_s24 = scalar_lea.vmem %s465_s2, %s468_s13  ;;  %s204_s27 = scalar_lea.vmem %s466_s3, %s381_s15 }
  0x11   : > { %v258_v3 = vld [vmem:[%s196_s21] sm:$0xff]  ;;  %v215_v4 = vsel %vm213_vm1, %v403_v2, 0 }
  0x12   : > { %263 = vperm.xlu0 %402, %v258_v3   ;;  %386 = vmatpush3.bf16.xpose.msra.mxu0 %v215_v4  ;;  %v377_v7 = vld [vmem:[%s199_s24] ss:$0 sm:$0xff] }
  0x16   : > { %268 = vperm.xlu0 %402, %v259_v5  }
  0x19   : > { %388 = vmatmul.mubr.msk.bf16.vlgmr.msra.gmra.mrb[0].mxu0 %vm213_vm1, %v403_v2 }
  0x91   : > { %v264_v6 = vpop.permute.xlu0 %263 }
  0x92   : > { %v277_v10 = vadd.f32 %v377_v7, %v264_v6 }
  0x95   : > { %v269_v8 = vpop.permute.xlu0 %268 }
  0x96   : > { %v278_v14 = vadd.f32 %v377_v7, %v269_v8 }
  0xec   : > { %v251_v9 = vpop.f32.mrb[0].mxu0 }
  0xed   : > { %v279_v11 = vmul.f32 2.0, %v251_v9  ;;  %v389_v12 = vpop.f32.mrb[1].mxu0 }
  0xee   : > { %v254_v13 = vpop.f32.mrb[2].mxu0 }
  0xef   : > { %v281_v15 = vsub.f32 %v277_v10, %v279_v11  ;;  %v280_v16 = vmul.f32 2.0, %v254_v13  ;;  %v390_v17 = vpop.f32.mrb[3].mxu0 }
  0xf1   : > { %v283_v18 = vmax.f32 %v281_v15, 0.0  ;;  %v282_v19 = vsub.f32 %v278_v14, %v280_v16 }
  0xf3   : > { %286 = vst.msk [vmem:[%s204_s27] sm:$0xff] %vm285_vm2, %v283_v18  ;;  %v284_v20 = vmax.f32 %v282_v19, 0.0 }
  0xf5   : > { %287 = vst.msk [vmem:[%s204_s27 + $0x8] sm:$0xff] %vm285_vm2, %v284_v20 }
  0xf6 PF: > { %s13_s12 = sadd.s32 1, %s410_s12  }
  0xf7   : > { %p10_p4 = scmp.ge.s32.totalorder %s13_s12, 4  }
  0xf9   :  { %12 = sbr.rel (!%p10_p4) target bundleno = 1 (0x1), region = 68 }

// kernel: custom-call.10
= control target key start
LH: loop header
LB: loop body
LE: loop exit
PB: predicated region body
PF: predicated region fallthrough
CT: control target
= control target key end

     0   :  { %s1672_s30 = smov 0   ;;  %s1674_s10 = smov 0   ;;  %s1981_s0 = inlined_call_operand.vmem [shape: f32[2,8,8], index: 0, kind: input, shape index: {}]   ;;  %s1982_s1 = inlined_call_operand.vmem [shape: f32[2,8,8], index: 1, kind: input, shape index: {}]   ;;  %s1983_s2 = inlined_call_operand.vmem [shape: f32[2,8,8], index: 2, kind: input, shape index: {}]   ;;  %s1984_s3 = inlined_call_operand.vmem [shape: f32[2,8,8], index: 3, kind: input, shape index: {}]   ;;  %s1985_s4 = inlined_call_operand.vmem [shape: f32[2,8], index: 4, kind: output, shape index: {0}]   ;;  %s1986_s5 = inlined_call_operand.vmem [shape: f32[2,8], index: 5, kind: output, shape index: {1}]   ;;  %s1987_s6 = inlined_call_operand.vmem [shape: f32[2,8,8], index: 6, kind: output, shape index: {2}]   ;;  %s1988_s7 = inlined_call_operand.vmem [shape: f32[2,8,8], index: 7, kind: output, shape index: {3}]   ;;  %s1989_s8 = inlined_call_operand.vmem [shape: f32[2,8,8], index: 8, kind: output, shape index: {4}]   ;;  %s1990_s9 = inlined_call_operand.vmem [shape: f32[2,8,8], index: 9, kind: output, shape index: {5}]  }
   0x1   :  { %s1676_s11 = smov 0  }
   0x2 LB: > { %s1688_s12 = sadd.s32 4294967295, %s1609_s11   ;;  %s1691_s13 = sadd.s32 1, %s1609_s11   ;;  %s1609_s11 = sphi %s1676_s11, %s1999_s11   ;;  %s1605_s10 = sphi %s1674_s10, %s1998_s10   ;;  %s1601_s30 = sphi %s1672_s30, %s1997_s30  }
   0x3   : > { %s20_s14 = sshrl.u32 %s1609_s11, 3  ;;  %s21_s15 = sshrl.u32 %s1691_s13, 3 }
   0x4   : > { %s22_s16 = ssub.s32 %s20_s14, %s21_s15  ;;  %s25_s17 = sadd.s32 1, %s1605_s10 }
   0x5   : > { %p23_p0 = scmp.eq.s32.totalorder %s22_s16, 0  ;;  %p35_p1 = scmp.ne.s32.totalorder %s1605_s10, %s1601_s30 }
   0x6   : > { %p36_p2 = scmp.eq.s32.totalorder %s1688_s12, 1  ;;  %p1470_p4 = scmp.ge.s32.totalorder %s1609_s11, 2 }
   0x7   : > { %s1700_s18 = scalar_select %p23_p0, %s1605_s10, %s25_s17  }
   0x8   : > { %p1702_p3 = por %p36_p2, %p35_p1  ;;  %86 = sbr.rel (%p1470_p4) target bundleno = 17 (0x11), region = 16 }
   0x9   : > { %1991 = sst [smem:[#allocation25_spill]] %s1700_s18  ;;  %s88_s20 = sand.u32 (!%p1470_p4), 1, %s1609_s11  }
   0xa   : > { %s1472_s21 = sshll.u32 (!%p1470_p4), %s1609_s11, 3  ;;  %s1471_s22 = sshll.u32 (!%p1470_p4), %s88_s20, 3 }
   0xb   : > { %s92_s25 = scalar_lea.vmem (!%p1470_p4), %s1981_s0, %s1472_s21  ;;  %s90_s26 = scalar_lea.vmem (!%p1470_p4), [#allocation0], %s1471_s22 }
   0xc   : > { %v120_v0 = vld [vmem:[%s92_s25] sm:$0xff] (!%p1470_p4)  ;;  %s130_s29 = scalar_lea.vmem (!%p1470_p4), %s1982_s1, %s1472_s21  ;;  %s168_s16 = scalar_lea.vmem (!%p1470_p4), %s1983_s2, %s1472_s21 }
   0xd   : > { %121 = vst [vmem:[%s90_s26] sm:$0xff] (!%p1470_p4), %v120_v0  ;;  %v158_v1 = vld [vmem:[%s130_s29] sm:$0xff] (!%p1470_p4)  ;;  %s128_s17 = scalar_lea.vmem (!%p1470_p4), [#allocation1], %s1471_s22  ;;  %s206_s23 = scalar_lea.vmem (!%p1470_p4), %s1984_s3, %s1472_s21 }
   0xe   : > { %159 = vst [vmem:[%s128_s17] sm:$0xff] (!%p1470_p4), %v158_v1  ;;  %v196_v2 = vld [vmem:[%s168_s16] sm:$0xff] (!%p1470_p4)  ;;  %s166_s24 = scalar_lea.vmem (!%p1470_p4), [#allocation2], %s1471_s22  ;;  %s204_s25 = scalar_lea.vmem (!%p1470_p4), [#allocation3], %s1471_s22 }
   0xf   : > { %197 = vst [vmem:[%s166_s24] sm:$0xff] %v196_v2  ;;  %v234_v3 = vld [vmem:[%s206_s23] sm:$0xff] }
  0x10   : > { %235 = vst [vmem:[%s204_s25] sm:$0xff] %v234_v3 }
  0x11 PF: > { %p1479_p5 = scmp.ge.s32.totalorder %s1609_s11, 1  ;;  %p240_p6 = scmp.lt.s32.totalorder %s1609_s11, 3 }
  0x13   : > { %p241_p7 = pnand %p1479_p5, %p240_p6 }
  0x15   : > { %244 = sbr.rel (%p241_p7) target bundleno = 992 (0x3e0), region = 156 }
  0x1c   : > { %s247_s26 = sand.u32 1, %s1688_s12   ;;  %s281_s27 = sand.u32 1, %s1601_s30   ;;  %v325_v4 = vlaneseq  ;;  %v1619_v11 = vmov 0.0  }
  0x1d   : > { %s1480_s28 = sshll.u32 %s247_s26, 3  ;;  %s1725_s18 = sshll.u32 %s281_s27, 1 }
  0x1e   : > { %v1727_v5 = vand.u32 127, %v325_v4  ;;  %v1729_v6 = vshrl.u32 %v325_v4, 7  ;;  %s249_s21 = scalar_lea.vmem [#allocation0], %s1480_s28  ;;  %s253_s22 = scalar_lea.vmem [#allocation1], %s1480_s28 }
  0x1f   : > { %v309_v7 = vld [vmem:[%s249_s21] sm:$0xff]  ;;  %v312_v8 = vld [vmem:[%s253_s22] sm:$0xff]  ;;  %s257_s29 = scalar_lea.vmem [#allocation2], %s1480_s28  ;;  %s261_s11 = scalar_lea.vmem [#allocation3], %s1480_s28 }
  0x20   : > { %v315_v9 = vld [vmem:[%s257_s29] sm:$0xff]  ;;  %v318_v10 = vld [vmem:[%s261_s11] sm:$0xff]  ;;  %s1731_s14 = scalar_lea.vmem [#allocation8], %s1480_s28  ;;  %s1734_s30 = scalar_lea.vmem [#allocation9], %s1480_s28  ;;  %v327_v5 = vmov %v1727_v5  ;;  %v330_v6 = vmov %v1729_v6  ;;  %vm1359_vm2 = vcmp.lt.s32.totalorder %v1727_v5, 8 }
  0x21   : > { %320 = vst [vmem:[%s1731_s14] sm:$0xff] %v1619_v11  ;;  %321 = vst [vmem:[%s1734_s30] sm:$0xff] %v1619_v11  ;;  %s308_s15 = smov [#allocation12]  ;;  %s311_s16 = smov [#allocation13]  ;;  %v340_v5 = vmov %v1727_v5  ;;  %v343_v6 = vmov %v1729_v6  ;;  %vm334_vm0 = vcmp.eq.s32.totalorder %v330_v6, %v327_v5 }
  0x22   : > { %s1737_s17 = scalar_lea.vmem [#allocation10], %s1480_s28  ;;  %s1740_s20 = scalar_lea.vmem [#allocation11], %s1480_s28  ;;  %310 = vst [vmem:[%s308_s15] sm:$0xff] %v309_v7  ;;  %313 = vst [vmem:[%s311_s16] sm:$0xff] %v312_v8  ;;  %vm347_vm1 = vcmp.eq.s32.totalorder %v343_v6, %v340_v5  ;;  %v1351_v5 = vmov %v1727_v5  ;;  %v1354_v6 = vmov %v1729_v6 }
  0x23   : > { %322 = vst [vmem:[%s1737_s17] sm:$0xff] %v1619_v11  ;;  %323 = vst [vmem:[%s1740_s20] sm:$0xff] %v1619_v11  ;;  %s314_s23 = smov [#allocation14]  ;;  %s317_s24 = smov [#allocation15]  ;;  %vm1364_vm3 = vcmp.eq.s32.totalorder %v1354_v6, %v1351_v5  ;;  %v1402_v5 = vmov %v1727_v5  ;;  %v1371_v6 = vmov %v1729_v6 }
  0x24   : > { %316 = vst [vmem:[%s314_s23] sm:$0xff] %v315_v9  ;;  %319 = vst [vmem:[%s317_s24] sm:$0xff] %v318_v10  ;;  %s324_s14 = smov %s1731_s14  ;;  %s337_s20 = smov %s1740_s20  ;;  %v1368_v5 = vmov %v1727_v5  ;;  %v1405_v6 = vmov %v1729_v6 }
  0x25   : > { %s283_s25 = scalar_lea.vmem [#allocation5], %s1725_s18  ;;  %s1355_s27 = smov [#allocation12]  ;;  %v1385_v5 = vmov %v1727_v5  ;;  %v1388_v6 = vmov %v1729_v6  ;;  %vm1415_vm4 = vcmp.eq.s32.totalorder %v1405_v6, %v1402_v5 }
  0x26   : > { %s1372_s28 = smov [#allocation13]  ;;  %s1389_s21 = smov [#allocation14] }
  0x27   : > { %s1406_s22 = smov [#allocation15] }
  0x28   : > { %v331_v12 = vld [vmem:[%s324_s14] sm:$0xff] }
  0x29   : > { %v335_v13 = vsel %vm334_vm0, 1.0, %v331_v12  ;;  %v1361_v16 = vld [vmem:[%s1355_s27] sm:$0xff] }
  0x2a   : > { %v344_v14 = vld [vmem:[%s337_s20] sm:$0xff]  ;;  %336 = vst [vmem:[%s324_s14] sm:$0xff] %v335_v13  ;;  %v1362_v18 = vsel %vm1359_vm2, %v1361_v16, 0.0 }
  0x2b   : > { %v348_v15 = vsel %vm347_vm1, 1.0, %v344_v14  ;;  %v1378_v17 = vld [vmem:[%s1372_s28] sm:$0xff]  ;;  %v1363_v22 = vmul.f32 %v1362_v18, %v1362_v18 }
  0x2c   : > { %349 = vst [vmem:[%s337_s20] sm:$0xff] %v348_v15  ;;  %v1379_v19 = vsel %vm1359_vm2, %v1378_v17, 0.0  ;;  %v1395_v20 = vld [vmem:[%s1389_s21] sm:$0xff] }
  0x2d   : > { %v1412_v21 = vld [vmem:[%s1406_s22] sm:$0xff]  ;;  %v1380_v23 = vmul.f32 %v1379_v19, %v1379_v19  ;;  %v1396_v24 = vsel %vm1359_vm2, %v1395_v20, 0.0  ;;  %v1365_v29 = vsel %vm1364_vm3, 0.0, %v1363_v22 }
  0x2e   : > { %v1413_v25 = vsel %vm1359_vm2, %v1412_v21, 0.0  ;;  %v1397_v26 = vmul.f32 %v1396_v24, %v1396_v24 }
  0x2f   : > { %v1382_v27 = vadd.f32 %v1380_v23, %v1363_v22  ;;  %v1414_v28 = vmul.f32 %v1413_v25, %v1413_v25  ;;  %v1381_v30 = vadd.f32 %v1380_v23, %v1365_v29 }
  0x31   : > { %v1399_v31 = vadd.f32 %v1397_v26, %v1382_v27  ;;  %v1398_v32 = vadd.f32 %v1397_v26, %v1381_v30  ;;  %v1416_v33 = vsel %vm1415_vm4, 0.0, %v1414_v28 }
  0x33   : > { %v1418_v34 = vadd.f32 %v1414_v28, %v1399_v31  ;;  %v1417_v35 = vadd.f32 %v1416_v33, %v1398_v32 }
  0x35   : > { %1419 = vadd.xlane.f32.xlu0 %v1418_v34 }
  0x39   : > { %1427 = vadd.xlane.f32.xlu0 %v1417_v35 }
  0xc2   : > { %v1420_v36 = vpop.xlane.xlu0 %1419 }
  0xc3   : > { %v1421_v37 = vrot.slane %v1420_v36, 4 }
  0xc5   : > { %v1422_v38 = vadd.f32 %v1421_v37, %v1420_v36 }
  0xc6   : > { %v1428_v39 = vpop.xlane.xlu0 %1427 }
  0xc7   : > { %v1423_v40 = vrot.slane %v1422_v38, 2  ;;  %v1429_v41 = vrot.slane %v1428_v39, 4 }
  0xc9   : > { %v1430_v42 = vadd.f32 %v1429_v41, %v1428_v39  ;;  %v1424_v43 = vadd.f32 %v1423_v40, %v1422_v38 }
  0xcb   : > { %v1431_v44 = vrot.slane %v1430_v42, 2  ;;  %v1425_v46 = vrot.slane %v1424_v43, 1 }
  0xcd   : > { %v1432_v45 = vadd.f32 %v1431_v44, %v1430_v42  ;;  %v1426_v49 = vadd.f32 %v1425_v46, %v1424_v43 }
  0xcf   : > { %v1433_v47 = vrot.slane %v1432_v45, 1 }
  0xd1   : > { %v1434_v48 = vadd.f32 %v1433_v47, %v1432_v45 }
  0xd3   : > { %1520 = vpush %v1434_v48 }
  0xd4   : > { %1522 = vpush %v1426_v49 }
 0x104   : > { %s1521_s29 = spop %1520 }
 0x105   : > { %s1523_s11 = spop %1522 }
 0x106   : > { %s1437_s15 = smul.f32 1e-10, %s1523_s11 }
 0x108   : > { %p1438_p8 = scmp.le.f32.partialorder %s1521_s29, %s1437_s15 }
 0x109   : > { %s1769_s16 = smov (!%p1438_p8), 0  }
 0x10a   : > { %1441 = sbr.rel (%p1438_p8) target bundleno = 948 (0x3b4), region = 499 }
 0x111 LB: >> { %s1774_s23 = smov 0   ;;  %s1613_s16 = sphi %s1769_s16, %s1993_s16  }
 0x112 LB: >>> { %s454_s24 = smov [#allocation12]  ;;  %v458_v5 = vmov %v1727_v5  ;;  %v461_v6 = vmov %v1729_v6  ;;  %s474_s27 = smov [#allocation13]  ;;  %vm777_vm14 = vcmp.eq.s32.totalorder %v1729_v6, 0  ;;  %vm789_vm15 = vcmp.eq.s32.totalorder %v1729_v6, 7  ;;  %s1617_s23 = sphi %s1774_s23, %s453_s23  }
 0x113   : >>> { %v478_v5 = vmov %v1727_v5  ;;  %v481_v6 = vmov %v1729_v6  ;;  %v462_v50 = vld [vmem:[%s454_s24] sm:$0xff]  ;;  %vm465_vm5 = vcmp.eq.s32.totalorder %v461_v6, %v458_v5  ;;  %s494_s28 = smov [#allocation15]  ;;  %s455_s21 = smov [#allocation16] }
 0x114   : >>> { %vm485_vm6 = vcmp.eq.s32.totalorder %v481_v6, %v478_v5  ;;  %v498_v5 = vmov %v1727_v5  ;;  %v501_v6 = vmov %v1729_v6  ;;  %v466_v51 = vsel %vm465_vm5, %v462_v50, 0.0  ;;  %v482_v52 = vld [vmem:[%s474_s27] sm:$0xff]  ;;  %s475_s22 = smov [#allocation17]  ;;  %s495_s29 = smov [#allocation18] }
 0x115   : >>> { %vm505_vm7 = vcmp.eq.s32.totalorder %v501_v6, %v498_v5  ;;  %v467_v53 = vrot.slane %v466_v51, 4  ;;  %v486_v54 = vsel %vm485_vm6, %v482_v52, 0.0  ;;  %v502_v55 = vld [vmem:[%s494_s28] sm:$0xff]  ;;  %s518_s11 = smov [#allocation17]  ;;  %s516_s15 = smov [#allocation16]  ;;  %v567_v5 = vmov %v1727_v5 }
 0x116   : >>> { %v487_v56 = vrot.slane %v486_v54, 4  ;;  %v506_v57 = vsel %vm505_vm7, %v502_v55, 0.0  ;;  %s520_s24 = smov [#allocation18]  ;;  %s555_s27 = smov [#allocation19]  ;;  %v570_v6 = vmov %v1729_v6  ;;  %v582_v5 = vmov %v1727_v5 }
 0x117   : >>> { %v468_v58 = vadd.f32 %v467_v53, %v466_v51  ;;  %v507_v59 = vrot.slane %v506_v57, 4  ;;  %s557_s28 = smov [#allocation20]  ;;  %v585_v6 = vmov %v1729_v6  ;;  %vm572_vm12 = vcmp.eq.s32.totalorder %v570_v6, %v567_v5  ;;  %s1796_s14 = smov %s1731_s14 }
 0x118   : >>> { %v488_v60 = vadd.f32 %v487_v56, %v486_v54  ;;  %vm587_vm13 = vcmp.eq.s32.totalorder %v585_v6, %v582_v5  ;;  %s1799_s30 = smov %s1734_s30  ;;  %s1802_s17 = smov %s1737_s17  ;;  %v825_v52 = vld [vmem:[%s1796_s14] sm:$0xff]  ;;  %v680_v5 = vmov %v1727_v5  ;;  %v683_v6 = vmov %v1729_v6 }
 0x119   : >>> { %v469_v61 = vrot.slane %v468_v58, 2  ;;  %v508_v62 = vadd.f32 %v507_v59, %v506_v57  ;;  %s1806_s20 = smov %s1740_s20  ;;  %v826_v53 = vld [vmem:[%s1799_s30] sm:$0xff]  ;;  %s819_s26 = smov [#allocation24]  ;;  %v653_v5 = vmov %v1727_v5  ;;  %v656_v6 = vmov %v1729_v6 }
 0x11a   : >>> { %v489_v63 = vrot.slane %v488_v60, 2  ;;  %v827_v56 = vld [vmem:[%s1802_s17] sm:$0xff]  ;;  %v694_v5 = vmov %v1727_v5  ;;  %v697_v6 = vmov %v1729_v6  ;;  %vm687_vm0 = vcmp.eq.s32.totalorder %v683_v6, %v680_v5  ;;  %s453_s23 = sadd.s32 1, %s1617_s23  }
 0x11b   : >>> { %v470_v0 = vadd.f32 %v469_v61, %v468_v58  ;;  %v509_v1 = vrot.slane %v508_v62, 2  ;;  %v828_v57 = vld [vmem:[%s1806_s20] sm:$0xff]  ;;  %v667_v5 = vmov %v1727_v5  ;;  %v670_v6 = vmov %v1729_v6  ;;  %p450_p9 = scmp.ge.s32.totalorder %s453_s23, 15  }
 0x11c   : >>> { %v490_v2 = vadd.f32 %v489_v63, %v488_v60  ;;  %vm661_vm1 = vcmp.eq.s32.totalorder %v656_v6, %v653_v5  ;;  %vm702_vm3 = vcmp.eq.s32.totalorder %v697_v6, %v694_v5  ;;  %vm674_vm4 = vcmp.eq.s32.totalorder %v670_v6, %v667_v5 }
 0x11d   : >>> { %v471_v3 = vrot.slane %v470_v0, 1  ;;  %v510_v4 = vadd.f32 %v509_v1, %v508_v62  ;;  %vm716_vm5 = vcmp.eq.s32.totalorder %v1727_v5, 0  ;;  %vm720_vm6 = vcmp.eq.s32.totalorder %v1727_v5, 1 }
 0x11e   : >>> { %v491_v7 = vrot.slane %v490_v2, 1  ;;  %vm733_vm7 = vcmp.eq.s32.totalorder %v1727_v5, 7  ;;  %v354_v5 = vmov (%p450_p9), %v1727_v5  ;;  %v357_v6 = vmov (%p450_p9), %v1729_v6 }
 0x11f   : >>> { %v472_v8 = vadd.f32 %v471_v3, %v470_v0  ;;  %v511_v9 = vrot.slane %v510_v4, 1  ;;  %v407_v5 = vmov (%p450_p9), %v1727_v5 }
 0x120   : >>> { %v492_v10 = vadd.f32 %v491_v7, %v490_v2 }
 0x121   : >>> { %473 = vst [vmem:[%s455_s21] sm:$0x1] %v472_v8  ;;  %v512_v11 = vadd.f32 %v511_v9, %v510_v4  ;;  %s514_s21 = smov [#allocation21] }
 0x122   : >>> { %493 = vst [vmem:[%s475_s22] sm:$0x1] %v492_v10  ;;  %s515_s22 = smov [#allocation22]  ;;  %s559_s21 = smov %s514_s21 }
 0x123   : >>> { %513 = vst [vmem:[%s495_s29] sm:$0x1] %v512_v11  ;;  %s561_s22 = smov %s515_s22  ;;  %s563_s29 = smov [#allocation21] }
 0x128   : >>> { %v517_v14 = vld [vmem:[%s516_s15] sm:$0xff]  ;;  %s576_s15 = smov [#allocation23] }
 0x129   : >>> { %v519_v12 = vld [vmem:[%s518_s11] sm:$0xff]  ;;  %v540_v27 = vand.u32 2147483647, %v517_v14  ;;  %s578_s11 = smov [#allocation22] }
 0x12a   : >>> { %v523_v13 = vmul.f32 2.0, %v519_v12  ;;  %v521_v15 = vld [vmem:[%s520_s24] sm:$0xff]  ;;  %v541_v32 = vand.u32 2147483647, %v519_v12  ;;  %s593_s24 = smov [#allocation23] }
 0x12b   : >>> { %v522_v16 = vsub.f32 %v521_v15, %v517_v14  ;;  %v542_v28 = vand.u32 2147483647, %v521_v15 }
 0x12c   : >>> { %1571 = vrcp.f32 %v523_v13 }
 0x12d   : >>> { %v543_v31 = vmin.f32 %v540_v27, %v542_v28 }
 0x12f   : >>> { %v544_v33 = vmul.f32 1.1920929e-08, %v543_v31 }
 0x131   : >>> { %vm545_vm11 = vcmp.le.f32.partialorder %v541_v32, %v544_v33 }
 0x136   : >>> { %v1572_v17 = vpop.eup %1571 }
 0x137   : >>> { %v525_v18 = vmul.f32 %v1572_v17, %v522_v16 }
 0x139   : >>> { %v527_v19 = vmul.f32 %v525_v18, %v525_v18  ;;  %vm526_vm10 = vcmp.ge.f32.partialorder %v525_v18, 0.0 }
 0x13b   : >>> { %v528_v20 = vadd.f32 1.0, %v527_v19 }
 0x13d   : >>> { %1573 = vrsqrt.f32 %v528_v20  ;;  %vm531_vm8 = vcmp.eq.f32.partialorder %v528_v20, inf  ;;  %v534_v22 = vand.u32 2147483648, %v528_v20  ;;  %vm533_vm9 = vcmp.eq.f32.partialorder %v528_v20, 0.0 }
 0x147   : >>> { %v1574_v21 = vpop.eup %1573 }
 0x148   : >>> { %v530_v23 = vmul.f32 %v1574_v21, %v528_v20 }
 0x14a   : >>> { %v532_v24 = vsel %vm531_vm8, %v528_v20, %v530_v23  ;;  %vm369_vm8 = vcmp.eq.s32.totalorder (%p450_p9), %v357_v6, %v354_v5  ;;  %v410_v6 = vmov (%p450_p9), %v1729_v6  ;;  %v373_v5 = vmov (%p450_p9), %v1727_v5 }
 0x14b   : >>> { %v535_v25 = vsel %vm533_vm9, %v534_v22, %v532_v24  ;;  %v376_v6 = vmov (%p450_p9), %v1729_v6  ;;  %v390_v5 = vmov (%p450_p9), %v1727_v5  ;;  %vm422_vm9 = vcmp.eq.s32.totalorder (%p450_p9), %v410_v6, %v407_v5 }
 0x14c   : >>> { %v536_v26 = vxor.u32 2147483648, %v535_v25  ;;  %v393_v6 = vmov (%p450_p9), %v1729_v6 }
 0x14e   : >>> { %v537_v29 = vsel %vm526_vm10, %v535_v25, %v536_v26 }
 0x14f   : >>> { %v538_v30 = vadd.f32 %v537_v29, %v525_v18 }
 0x151   : >>> { %1575 = vrcp.f32 %v538_v30 }
 0x15b   : >>> { %v1576_v34 = vpop.eup %1575 }
 0x15c   : >>> { %v546_v35 = vsel %vm545_vm11, 0.0, %v1576_v34 }
 0x15d   : >>> { %v547_v36 = vmul.f32 %v546_v35, %v546_v35  ;;  %v551_v37 = vmul.f32 %v546_v35, %v519_v12 }
 0x15f   : >>> { %v548_v38 = vadd.f32 1.0, %v547_v36  ;;  %v552_v39 = vsub.f32 %v517_v14, %v551_v37  ;;  %v554_v40 = vadd.f32 %v551_v37, %v521_v15 }
 0x161   : >>> { %1577 = vrsqrt.f32 %v548_v38  ;;  %556 = vst [vmem:[%s555_s27] sm:$0xff] %v552_v39  ;;  %558 = vst [vmem:[%s557_s28] sm:$0xff] %v554_v40  ;;  %s1789_s27 = smov [#allocation12]  ;;  %s591_s28 = smov [#allocation24] }
 0x162   : >>> { %v601_v49 = vld [vmem:[%s1789_s27] sm:$0xff] }
 0x16b   : >>> { %v1578_v41 = vpop.eup %1577 }
 0x16c   : >>> { %560 = vst [vmem:[%s559_s21] sm:$0xff] %v1578_v41  ;;  %v550_v42 = vmul.f32 %v1578_v41, %v546_v35  ;;  %s1791_s21 = smov [#allocation13] }
 0x16d   : >>> { %v602_v50 = vld [vmem:[%s1791_s21] sm:$0xff] }
 0x16e   : >>> { %562 = vst [vmem:[%s561_s22] sm:$0xff] %v550_v42  ;;  %s1793_s22 = smov [#allocation15] }
 0x16f   : >>> { %v604_v51 = vld [vmem:[%s1793_s22] sm:$0xff] }
 0x173   : >>> { %v564_v43 = vld [vmem:[%s563_s29] ss:$0 sm:$0xff]  ;;  %s817_s29 = smov [#allocation23] }
 0x174   : >>> { %v573_v44 = vsel %vm572_vm12, %v564_v43, 0.0 }
 0x175   : >>> { %574 = vadd.xlane.f32.xlu0 %v573_v44  ;;  %v579_v45 = vld [vmem:[%s578_s11] ss:$0 sm:$0xff]  ;;  %s1808_s11 = smov [#allocation14] }
 0x176   : >>> { %v588_v46 = vsel %vm587_vm13, %v579_v45, 0.0  ;;  %v603_v58 = vld [vmem:[%s1808_s11] sm:$0xff] }
 0x179   : >>> { %589 = vadd.xlane.f32.xlu0 %v588_v46 }
 0x202   : >>> { %v575_v47 = vpop.xlane.xlu0 %574 }
 0x203   : >>> { %577 = vst [vmem:[%s576_s15] sm:$0xff] %v575_v47  ;;  %s595_s15 = smov [#allocation24] }
 0x206   : >>> { %v590_v48 = vpop.xlane.xlu0 %589 }
 0x207   : >>> { %592 = vst [vmem:[%s591_s28] sm:$0xff] %v590_v48  ;;  %s1835_s28 = smov [#allocation14] }
 0x20a   : >>> { %v594_v54 = vld [vmem:[%s593_s24] sm:$0xff]  ;;  %s623_s24 = smov [#allocation22] }
 0x20b   : >>> { %v818_v55 = vld [vmem:[%s817_s29] sm:$0xff]  ;;  %v605_v59 = vmul.f32 %v601_v49, %v594_v54  ;;  %v608_v60 = vmul.f32 %v602_v50, %v594_v54  ;;  %v615_v61 = vmul.f32 %v604_v51, %v594_v54  ;;  %v612_v4 = vmul.f32 %v603_v58, %v594_v54  ;;  %s650_s29 = smov [#allocation19] }
 0x20c   : >>> { %v829_v62 = vmul.f32 %v825_v52, %v818_v55  ;;  %v832_v63 = vmul.f32 %v826_v53, %v818_v55  ;;  %v836_v0 = vmul.f32 %v827_v56, %v818_v55  ;;  %v839_v1 = vmul.f32 %v828_v57, %v818_v55  ;;  %v624_v24 = vld [vmem:[%s623_s24] ss:$0 sm:$0xff]  ;;  %s690_s24 = smov [#allocation15] }
 0x20d   : >>> { %v657_v55 = vld [vmem:[%s650_s29] ss:$0 sm:$0xff]  ;;  %s706_s29 = smov [#allocation13] }
 0x20e   : >>> { %v596_v2 = vld [vmem:[%s595_s15] sm:$0xff]  ;;  %s677_s15 = smov [#allocation14] }
 0x20f   : >>> { %v820_v3 = vld [vmem:[%s819_s26] sm:$0xff]  ;;  %v609_v7 = vmul.f32 %v604_v51, %v596_v2  ;;  %v611_v8 = vmul.f32 %v601_v49, %v596_v2  ;;  %v614_v9 = vmul.f32 %v602_v50, %v596_v2  ;;  %v606_v14 = vmul.f32 %v603_v58, %v596_v2  ;;  %s621_s26 = smov [#allocation21] }
 0x210   : >>> { %v830_v10 = vmul.f32 %v827_v56, %v820_v3  ;;  %v833_v11 = vmul.f32 %v828_v57, %v820_v3  ;;  %v835_v12 = vmul.f32 %v825_v52, %v820_v3  ;;  %v838_v13 = vmul.f32 %v826_v53, %v820_v3  ;;  %v622_v23 = vld [vmem:[%s621_s26] ss:$0 sm:$0xff]  ;;  %s649_s26 = smov [#allocation12] }
 0x211   : >>> { %v610_v15 = vsub.f32 %v608_v60, %v609_v7  ;;  %v616_v16 = vadd.f32 %v615_v61, %v614_v9  ;;  %v613_v18 = vadd.f32 %v612_v4, %v611_v8  ;;  %v607_v22 = vsub.f32 %v605_v59, %v606_v14 }
 0x212   : >>> { %v831_v17 = vsub.f32 %v829_v62, %v830_v10  ;;  %v834_v19 = vsub.f32 %v832_v63, %v833_v11  ;;  %v837_v20 = vadd.f32 %v836_v0, %v835_v12  ;;  %v840_v21 = vadd.f32 %v839_v1, %v838_v13 }
 0x213   : >>> { %618 = vst [vmem:[%s1791_s21] sm:$0xff] %v610_v15  ;;  %620 = vst [vmem:[%s1793_s22] sm:$0xff] %v616_v16  ;;  %s1837_s21 = smov [#allocation15]  ;;  %s1841_s22 = smov [#allocation13] }
 0x214   : >>> { %841 = vst [vmem:[%s1796_s14] sm:$0xff] %v831_v17  ;;  %619 = vst [vmem:[%s1808_s11] sm:$0xff] %v613_v18  ;;  %s845_s14 = smov %s1731_s14  ;;  %s691_s11 = smov [#allocation20] }
 0x215   : >>> { %842 = vst [vmem:[%s1799_s30] sm:$0xff] %v834_v19  ;;  %843 = vst [vmem:[%s1802_s17] sm:$0xff] %v837_v20  ;;  %s846_s17 = smov %s1737_s17  ;;  %s1828_s30 = smov %s1734_s30  ;;  %v698_v56 = vld [vmem:[%s691_s11] ss:$0 sm:$0xff] }
 0x216   : >>> { %844 = vst [vmem:[%s1806_s20] sm:$0xff] %v840_v21  ;;  %617 = vst [vmem:[%s1789_s27] sm:$0xff] %v607_v22  ;;  %s1831_s20 = smov %s1740_s20  ;;  %s1839_s27 = smov [#allocation12] }
 0x217   : >>> { %s1621_s11 = smov 127  }
 0x21a   : >>> { %v632_v39 = vld [vmem:[%s1837_s21] sm:$0xff] }
 0x21b   : >>> { %v847_v25 = vld [vmem:[%s845_s14] ss:$0 sm:$0xff]  ;;  %v1499_v27 = vld [vmem:[%s845_s14 + $0x7] ss:$0 sm:$0xff]  ;;  %v640_v42 = vmul.f32 %v632_v39, %v624_v24  ;;  %v643_v46 = vmul.f32 %v632_v39, %v622_v23 }
 0x21c   : >>> { %v1498_v26 = vld [vmem:[%s845_s14 - $0x1] sm:$0xfe]  ;;  %v1503_v34 = vld [vmem:[%s1828_s30 + $0x7] ss:$0 sm:$0xff] }
 0x21d   : >>> { %v854_v28 = vsel %vm777_vm14, %v847_v25, %v1498_v26  ;;  %v858_v29 = vld [vmem:[%s846_s17] ss:$0 sm:$0xff]  ;;  %v1501_v30 = vld [vmem:[%s846_s17 + $0x1] sm:$0x7f] }
 0x21e   : >>> { %v871_v31 = vld [vmem:[%s1828_s30] ss:$0 sm:$0xff]  ;;  %857 = vst [vmem:[%s845_s14] sm:$0xff] %v854_v28  ;;  %v866_v32 = vsel %vm789_vm15, %v1499_v27, %v1501_v30  ;;  %v1505_v37 = vld [vmem:[%s1831_s20 + $0x1] sm:$0x7f] }
 0x21f   : >>> { %v1502_v33 = vld [vmem:[%s1828_s30 - $0x1] sm:$0xfe]  ;;  %1500 = vst [vmem:[%s845_s14 + $0x1] sm:$0x1] %v858_v29  ;;  %868 = vst [vmem:[%s846_s17] sm:$0xff] %v866_v32  ;;  %v890_v40 = vsel %vm789_vm15, %v1503_v34, %v1505_v37 }
 0x220   : >>> { %v882_v35 = vld [vmem:[%s1831_s20] ss:$0 sm:$0xff]  ;;  %v878_v36 = vsel %vm777_vm14, %v871_v31, %v1502_v33 }
 0x221   : >>> { %v631_v38 = vld [vmem:[%s1835_s28] sm:$0xff]  ;;  %881 = vst [vmem:[%s1828_s30] sm:$0xff] %v878_v36  ;;  %892 = vst [vmem:[%s1831_s20] sm:$0xff] %v890_v40 }
 0x222   : >>> { %v639_v41 = vmul.f32 %v631_v38, %v622_v23  ;;  %v642_v43 = vmul.f32 %v631_v38, %v624_v24  ;;  %v629_v44 = vld [vmem:[%s1839_s27] sm:$0xff]  ;;  %1504 = vst [vmem:[%s1828_s30 + $0x1] sm:$0x1] %v882_v35 }
 0x223   : >>> { %v630_v45 = vld [vmem:[%s1841_s22] sm:$0xff]  ;;  %v633_v47 = vmul.f32 %v629_v44, %v622_v23  ;;  %v636_v49 = vmul.f32 %v629_v44, %v624_v24 }
 0x224   : >>> { %v634_v48 = vmul.f32 %v630_v45, %v624_v24  ;;  %v641_v50 = vsub.f32 %v639_v41, %v640_v42  ;;  %v637_v51 = vmul.f32 %v630_v45, %v622_v23  ;;  %v644_v52 = vadd.f32 %v643_v46, %v642_v43 }
 0x226   : >>> { %v635_v53 = vsub.f32 %v633_v47, %v634_v48  ;;  %647 = vst [vmem:[%s1835_s28] sm:$0xff] %v641_v50  ;;  %v638_v54 = vadd.f32 %v637_v51, %v636_v49  ;;  %648 = vst [vmem:[%s1837_s21] sm:$0xff] %v644_v52  ;;  %s664_s28 = smov [#allocation13]  ;;  %s1875_s21 = smov [#allocation14] }
 0x228   : >>> { %645 = vst [vmem:[%s1839_s27] sm:$0xff] %v635_v53  ;;  %646 = vst [vmem:[%s1841_s22] sm:$0xff] %v638_v54  ;;  %s705_s27 = smov [#allocation12]  ;;  %s1620_s22 = smov 1  }
 0x22d   : >>> { %v684_v57 = vld [vmem:[%s677_s15] sm:$0xff] }
 0x22e   : >>> { %v688_v58 = vsel %vm687_vm0, 0.0, %v684_v57  ;;  %v699_v60 = vld [vmem:[%s690_s24] sm:$0xff] }
 0x22f   : >>> { %v658_v59 = vld [vmem:[%s649_s26] sm:$0xff]  ;;  %689 = vst [vmem:[%s677_s15] sm:$0xff] %v688_v58  ;;  %v703_v63 = vsel %vm702_vm3, %v698_v56, %v699_v60  ;;  %s1878_s15 = smov [#allocation15] }
 0x230   : >>> { %v662_v61 = vsel %vm661_vm1, %v657_v55, %v658_v59  ;;  %v671_v62 = vld [vmem:[%s664_s28] sm:$0xff]  ;;  %704 = vst [vmem:[%s690_s24] sm:$0xff] %v703_v63  ;;  %s793_s24 = smov [#allocation13] }
 0x231   : >>> { %663 = vst [vmem:[%s649_s26] sm:$0xff] %v662_v61  ;;  %v675_v0 = vsel %vm674_vm4, 0.0, %v671_v62  ;;  %s769_s26 = smov [#allocation12] }
 0x232   : >>> { %676 = vst [vmem:[%s664_s28] sm:$0xff] %v675_v0  ;;  %s770_s28 = smov [#allocation14] }
 0x236   : >>> { %v743_v1 = vld [vmem:[%s1875_s21] sm:$0xff] }
 0x237   : >>> { %744 = vrot.lane.b32.xlu0 %v743_v1, %s1620_s22  ;;  %v739_v4 = vld [vmem:[%s1878_s15] sm:$0xff] }
 0x238   : >>> { %v711_v2 = vld [vmem:[%s705_s27] sm:$0xff] }
 0x239   : >>> { %712 = vrot.lane.b32.xlu1 %v711_v2, %s1620_s22  ;;  %v707_v3 = vld [vmem:[%s706_s29] sm:$0xff] }
 0x23d   : >>> { %708 = vrot.lane.b32.xlu1 %v707_v3, %s1620_s22 }
 0x241   : >>> { %729 = vrot.lane.b32.xlu1 %v707_v3, %s1621_s11 }
 0x245   : >>> { %740 = vrot.lane.b32.xlu1 %v739_v4, %s1620_s22  ;;  %s358_s22 = smov (%p450_p9), [#allocation12] }
 0x249   : >>> { %761 = vrot.lane.b32.xlu1 %v739_v4, %s1621_s11  ;;  %s394_s11 = smov (%p450_p9), [#allocation14] }
 0x2a9   : >>> { %v745_v13 = vpop.permute.xlu0 %744 }
 0x2aa   : >>> { %v749_v15 = vsel %vm716_vm5, %v743_v1, %v745_v13 }
 0x2ab   : >>> { %v713_v7 = vpop.permute.xlu1 %712 }
 0x2ac   : >>> { %v717_v8 = vsel %vm716_vm5, %v711_v2, %v713_v7 }
 0x2af   : >>> { %v709_v9 = vpop.permute.xlu1 %708 }
 0x2b0   : >>> { %v721_v10 = vsel %vm720_vm6, %v709_v9, %v717_v8 }
 0x2b1   : >>> { %v727_v11 = vsel %vm1359_vm2, %v721_v10, 0.0 }
 0x2b2   : >>> { %735 = vst [vmem:[%s705_s27] sm:$0xff] %v727_v11  ;;  %s794_s27 = smov [#allocation15] }
 0x2b3   : >>> { %v730_v12 = vpop.permute.xlu1 %729 }
 0x2b4   : >>> { %v734_v14 = vsel %vm733_vm7, %v711_v2, %v730_v12 }
 0x2b5   : >>> { %736 = vst [vmem:[%s706_s29] sm:$0xff] %v734_v14  ;;  %s377_s29 = smov (%p450_p9), [#allocation13] }
 0x2b7   : >>> { %v741_v16 = vpop.permute.xlu1 %740 }
 0x2b8   : >>> { %v753_v17 = vsel %vm720_vm6, %v741_v16, %v749_v15 }
 0x2b9   : >>> { %v771_v18 = vld [vmem:[%s769_s26] ss:$0 sm:$0xff]  ;;  %v1491_v20 = vld [vmem:[%s769_s26 + $0x7] ss:$0 sm:$0xff]  ;;  %v759_v22 = vsel %vm1359_vm2, %v753_v17, 0.0 }
 0x2ba   : >>> { %v1490_v19 = vld [vmem:[%s769_s26 - $0x1] sm:$0xfe]  ;;  %767 = vst [vmem:[%s1875_s21] sm:$0xff] %v759_v22  ;;  %s893_s21 = sadd.s32 (%p450_p9), 1, %s1613_s16  }
 0x2bb   : >>> { %v778_v21 = vsel %vm777_vm14, %v771_v18, %v1490_v19  ;;  %v762_v23 = vpop.permute.xlu1 %761  ;;  %p446_p10 = scmp.ge.s32.totalorder (%p450_p9), %s893_s21, 15  ;;  %s1993_s16 = smov (%p450_p9), %s893_s21 }
 0x2bc   : >>> { %781 = vst [vmem:[%s769_s26] sm:$0xff] %v778_v21  ;;  %v795_v24 = vld [vmem:[%s793_s24] ss:$0 sm:$0xff]  ;;  %v1495_v26 = vld [vmem:[%s793_s24 + $0x7] ss:$0 sm:$0xff]  ;;  %v766_v27 = vsel %vm733_vm7, %v743_v1, %v762_v23 }
 0x2bd   : >>> { %v1494_v25 = vld [vmem:[%s793_s24 - $0x1] sm:$0xfe]  ;;  %768 = vst [vmem:[%s1878_s15] sm:$0xff] %v766_v27  ;;  %s411_s15 = smov (%p450_p9), [#allocation15] }
 0x2be   : >>> { %v802_v28 = vsel %vm777_vm14, %v795_v24, %v1494_v25 }
 0x2bf   : >>> { %805 = vst [vmem:[%s793_s24] sm:$0xff] %v802_v28 }
 0x2c1   : >>> { %v782_v29 = vld [vmem:[%s770_s28] ss:$0 sm:$0xff]  ;;  %v1493_v30 = vld [vmem:[%s770_s28 + $0x1] sm:$0x7f] }
 0x2c2   : >>> { %1492 = vst [vmem:[%s769_s26 + $0x1] sm:$0x1] %v782_v29  ;;  %v790_v31 = vsel %vm789_vm15, %v1491_v20, %v1493_v30  ;;  %452 = sbr.rel (!%p450_p9) target bundleno = 274 (0x112), region = 494 }
 0x2c3   : >>> { %792 = vst [vmem:[%s770_s28] sm:$0xff] %v790_v31 }
 0x2c4   : >>> { %v806_v32 = vld [vmem:[%s794_s27] ss:$0 sm:$0xff]  ;;  %v1497_v33 = vld [vmem:[%s794_s27 + $0x1] sm:$0x7f] }
 0x2c5   : >>> { %1496 = vst [vmem:[%s793_s24 + $0x1] sm:$0x1] %v806_v32  ;;  %v814_v34 = vsel %vm789_vm15, %v1495_v26, %v1497_v33 }
 0x2c6   : >>> { %816 = vst [vmem:[%s794_s27] sm:$0xff] %v814_v34 }
 0x2c9   : >> { %v364_v35 = vld [vmem:[%s358_s22] sm:$0xff] }
 0x2ca   : >> { %v365_v37 = vsel %vm1359_vm2, %v364_v35, 0.0  ;;  %v400_v39 = vld [vmem:[%s394_s11] sm:$0xff] }
 0x2cb   : >> { %v366_v41 = vmul.f32 %v365_v37, %v365_v37  ;;  %v401_v43 = vsel %vm1359_vm2, %v400_v39, 0.0 }
 0x2cc   : >> { %v383_v36 = vld [vmem:[%s377_s29] sm:$0xff]  ;;  %v402_v45 = vmul.f32 %v401_v43, %v401_v43 }
 0x2cd   : >> { %v384_v38 = vsel %vm1359_vm2, %v383_v36, 0.0  ;;  %v417_v40 = vld [vmem:[%s411_s15] sm:$0xff]  ;;  %v370_v48 = vsel %vm369_vm8, 0.0, %v366_v41 }
 0x2ce   : >> { %v385_v42 = vmul.f32 %v384_v38, %v384_v38  ;;  %v418_v44 = vsel %vm1359_vm2, %v417_v40, 0.0 }
 0x2cf   : >> { %v419_v47 = vmul.f32 %v418_v44, %v418_v44 }
 0x2d0   : >> { %v387_v46 = vadd.f32 %v385_v42, %v366_v41  ;;  %v386_v49 = vadd.f32 %v385_v42, %v370_v48 }
 0x2d1   : >> { %v423_v52 = vsel %vm422_vm9, 0.0, %v419_v47 }
 0x2d2   : >> { %v404_v50 = vadd.f32 %v402_v45, %v387_v46  ;;  %v403_v51 = vadd.f32 %v402_v45, %v386_v49 }
 0x2d4   : >> { %v425_v53 = vadd.f32 %v419_v47, %v404_v50  ;;  %v424_v54 = vadd.f32 %v423_v52, %v403_v51 }
 0x2d6   : >> { %426 = vadd.xlane.f32.xlu0 %v425_v53 }
 0x2da   : >> { %434 = vadd.xlane.f32.xlu0 %v424_v54 }
 0x363   : >> { %v427_v55 = vpop.xlane.xlu0 %426 }
 0x364   : >> { %v428_v56 = vrot.slane %v427_v55, 4 }
 0x366   : >> { %v429_v57 = vadd.f32 %v428_v56, %v427_v55 }
 0x367   : >> { %v435_v58 = vpop.xlane.xlu0 %434 }
 0x368   : >> { %v430_v59 = vrot.slane %v429_v57, 2  ;;  %v436_v60 = vrot.slane %v435_v58, 4 }
 0x36a   : >> { %v437_v61 = vadd.f32 %v436_v60, %v435_v58  ;;  %v431_v62 = vadd.f32 %v430_v59, %v429_v57 }
 0x36c   : >> { %v438_v63 = vrot.slane %v437_v61, 2  ;;  %v432_v1 = vrot.slane %v431_v62, 1 }
 0x36e   : >> { %v439_v0 = vadd.f32 %v438_v63, %v437_v61  ;;  %v433_v4 = vadd.f32 %v432_v1, %v431_v62 }
 0x370   : >> { %v440_v2 = vrot.slane %v439_v0, 1 }
 0x372   : >> { %v441_v3 = vadd.f32 %v440_v2, %v439_v0 }
 0x374   : >> { %1524 = vpush %v441_v3 }
 0x375   : >> { %1526 = vpush %v433_v4 }
 0x3a5   : >> { %s1525_s23 = spop %1524 }
 0x3a6   : >> { %s1527_s26 = spop %1526 }
 0x3a7   : >> { %s444_s24 = smul.f32 1e-10, %s1527_s26 }
 0x3a9   : >> { %p445_p11 = scmp.le.f32.partialorder %s1525_s23, %s444_s24 }
 0x3ab   : >> { %p447_p12 = por %p446_p10, %p445_p11 }
 0x3ad   : > { %895 = sbr.rel (!%p447_p12) target bundleno = 273 (0x111), region = 505 }
 0x3b4 PF: > { %s900_s28 = smov [#allocation12]  ;;  %v904_v5 = vmov %v1727_v5  ;;  %v907_v6 = vmov %v1729_v6  ;;  %s920_s27 = smov [#allocation15] }
 0x3b5   : > { %v924_v5 = vmov %v1727_v5  ;;  %v927_v6 = vmov %v1729_v6  ;;  %v908_v7 = vld [vmem:[%s900_s28] sm:$0xff]  ;;  %vm911_vm10 = vcmp.eq.s32.totalorder %v907_v6, %v904_v5  ;;  %s896_s16 = sand.u32 7, %s1688_s12   ;;  %s1994_s29 = scalar_lea.vmem [#allocation7], %s1725_s18 }
 0x3b6   : > { %vm931_vm11 = vcmp.eq.s32.totalorder %v927_v6, %v924_v5  ;;  %v912_v8 = vsel %vm911_vm10, %v908_v7, 0.0  ;;  %v928_v10 = vld [vmem:[%s920_s27] sm:$0xff]  ;;  %s897_s21 = scalar_lea.vmem [#allocation4], %s896_s16  ;;  %s899_s22 = scalar_lea.vmem [#allocation6], %s896_s16 }
 0x3b7   : > { %v913_v9 = vrot.slane %v912_v8, 4  ;;  %v932_v11 = vsel %vm931_vm11, %v928_v10, 0.0  ;;  %s901_s21 = smov %s897_s21  ;;  %s921_s22 = smov %s899_s22 }
 0x3b8   : > { %v933_v13 = vrot.slane %v932_v11, 4  ;;  %s979_s11 = sshrl.u32 (%p1702_p3), %s1688_s12, 3 }
 0x3b9   : > { %v914_v12 = vadd.f32 %v913_v9, %v912_v8  ;;  %s1512_s15 = sshll.u32 (%p1702_p3), %s979_s11, 1 }
 0x3ba   : > { %v934_v15 = vadd.f32 %v933_v13, %v932_v11  ;;  %s981_s24 = scalar_lea.vmem (%p1702_p3), %s1985_s4, %s1512_s15 }
 0x3bb   : > { %v915_v14 = vrot.slane %v914_v12, 2 }
 0x3bc   : > { %v935_v17 = vrot.slane %v934_v15, 2 }
 0x3bd   : > { %v916_v16 = vadd.f32 %v915_v14, %v914_v12 }
 0x3be   : > { %v936_v19 = vadd.f32 %v935_v17, %v934_v15 }
 0x3bf   : > { %v917_v18 = vrot.slane %v916_v16, 1 }
 0x3c0   : > { %v937_v5 = vrot.slane %v936_v19, 1 }
 0x3c1   : > { %v918_v20 = vadd.f32 %v917_v18, %v916_v16 }
 0x3c2   : > { %v938_v6 = vadd.f32 %v937_v5, %v936_v19 }
 0x3c3   : > { %919 = vst [vmem:[%s901_s21] sm:$0x1] %v918_v20 }
 0x3c4   : > { %939 = vst [vmem:[%s921_s22] sm:$0x1] %v938_v6 }
 0x3c6   : > { %978 = sbr.rel (!%p1702_p3) target bundleno = 980 (0x3d4), region = 174 }
 0x3ca   : > { %v943_v21 = vld [vmem:[#allocation4] sm:$0x3] }
 0x3cb   : > { %945 = vst [vmem:[%s283_s25] sm:$0x3] %v943_v21  ;;  %v949_v22 = vld [vmem:[#allocation6] sm:$0x3] }
 0x3cc   : > { %951 = vst [vmem:[%s1994_s29] sm:$0x3] %v949_v22 }
 0x3d2   : > { %v997_v23 = vld [vmem:[%s283_s25] sm:$0x3] }
 0x3d3   : > { %998 = vst [vmem:[%s981_s24] sm:$0x3] %v997_v23 }
 0x3d4 PF: > { %1015 = sbr.rel (!%p1702_p3) target bundleno = 988 (0x3dc), region = 208  ;;  %s1016_s28 = sshrl.u32 (%p1702_p3), %s1688_s12, 3 }
 0x3d5   : > { %s1995_s27 = scalar_lea.vmem (%p1702_p3), [#allocation7], %s1725_s18  ;;  %s1513_s16 = sshll.u32 (%p1702_p3), %s1016_s28, 1 }
 0x3d6   : > { %s1018_s25 = scalar_lea.vmem (%p1702_p3), %s1986_s5, %s1513_s16 }
 0x3da   : > { %v1034_v24 = vld [vmem:[%s1995_s27] sm:$0x3] (%p1702_p3) }
 0x3db   : > { %1035 = vst [vmem:[%s1018_s25] sm:$0x3] %v1034_v24 }
 0x3dc PF: > { %s1514_s29 = sshll.u32 %s1688_s12, 3  ;;  %v1079_v25 = vld [vmem:[%s1731_s14] sm:$0xff]  ;;  %v1113_v26 = vld [vmem:[%s1734_s30] sm:$0xff] }
 0x3dd   : > { %v1147_v27 = vld [vmem:[%s1737_s17] sm:$0xff]  ;;  %s1051_s18 = scalar_lea.vmem %s1987_s6, %s1514_s29  ;;  %s1085_s26 = scalar_lea.vmem %s1988_s7, %s1514_s29  ;;  %v1181_v28 = vld [vmem:[%s1740_s20] sm:$0xff] }
 0x3de   : > { %1080 = vst [vmem:[%s1051_s18] sm:$0xff] %v1079_v25  ;;  %1114 = vst [vmem:[%s1085_s26] sm:$0xff] %v1113_v26  ;;  %s1119_s27 = scalar_lea.vmem %s1989_s8, %s1514_s29  ;;  %s1153_s14 = scalar_lea.vmem %s1990_s9, %s1514_s29 }
 0x3df   : > { %1148 = vst [vmem:[%s1119_s27] sm:$0xff] %v1147_v27  ;;  %1182 = vst [vmem:[%s1153_s14] sm:$0xff] %v1181_v28 }
 0x3e0 PF: > { %s1996_s17 = sld [smem:[#allocation25_spill]]  ;;  %p13_p13 = scmp.ge.s32.totalorder %s1691_s13, 4  }
 0x3e1   : > { %s1997_s30 = smov %s1605_s10  ;;  %s1999_s11 = smov %s1691_s13 }
 0x3e2   :  { %15 = sbr.rel (!%p13_p13) target bundleno = 2 (0x2), region = 516 }
 0x3e6   : > { %s1998_s10 = smov %s1996_s17 }

// kernel: _lambda_.5
= control target key start
LH: loop header
LB: loop body
LE: loop exit
PB: predicated region body
PF: predicated region fallthrough
CT: control target
= control target key end

     0   :  { %8 = vsyncpa [#allocation3], 0  ;;  %s533_s12 = smov 0   ;;  %s589_s0 = inlined_call_operand.vmem [shape: f32[2,16,16], index: 0, kind: input, shape index: {}]   ;;  %s590_s1 = inlined_call_operand.vmem [shape: s8[2,16,16], index: 1, kind: input, shape index: {}]   ;;  %s591_s2 = inlined_call_operand.vmem [shape: f32[2], index: 2, kind: input, shape index: {}]   ;;  %s592_s3 = inlined_call_operand.vmem [shape: f32[2,16,16], index: 3, kind: output, shape index: {}]  }
   0x1 LB: > { %s539_s13 = sadd.s32 4294967295, %s506_s12   ;;  %p414_p0 = scmp.ge.s32.totalorder %s506_s12, 1  ;;  %s506_s12 = sphi %s533_s12, %s14_s12  }
   0x2   : > { %p118_p1 = scmp.lt.s32.totalorder %s506_s12, 3  ;;  %s131_s16 = sshll.u32 %s591_s2, 4  ;;  %s132_s16 = int_to_ptr.vmem [resolvable:$true] %s131_s16 }
   0x3   : > { %p456_p3 = scmp.eq.s32.totalorder %s539_s13, 0  ;;  %s481_s18 = scalar_lea.vmem %s132_s16, 16 }
   0x4   : > { %p546_p2 = pnand %p414_p0, %p118_p1  ;;  %p482_p6 = scmp.ne.s32.totalorder %s132_s16, %s481_s18 }
   0x5   : > { %p489_p10 = scmp.lt.s32.totalorder %s132_s16, %s132_s16  ;;  %p490_p11 = scmp.lt.s32.totalorder %s481_s18, %s481_s18 }
   0x6   : > { %p452_p4 = pneg %p546_p2 }
   0x7   : > { %p491_p12 = por %p490_p11, %p489_p10 }
   0x8   : > { %p453_p5 = pnand %p456_p3, %p452_p4 }
   0xa   : > { %p483_p7 = pneg %p453_p5 }
   0xc   : > { %p484_p8 = pnand %p483_p7, %p482_p6 }
   0xe   : > { %p485_p9 = pneg %p484_p8 }
  0x10   : > { %p492_p13 = pnand %p491_p12, %p485_p9 }
  0x12   : > { %495 = shalt.err (!%p492_p13)
}
  0x13   : > { %s508_s19 = smov [#allocation2]   ;;  %160 = sbr.rel (%p546_p2) target bundleno = 293 (0x125), region = 32 }
  0x14   : > { %455 = dma.vmem_to_smem (!%p453_p5), %s132_s16, 16, %s508_s19, [#allocation3]  }
  0x1a   : > { %501 = dma.done.wait (%p456_p3), [#allocation3], 16  }
  0x1b   : > { %503 = vsyncadd (%p456_p3), [#allocation3], 4294967280 }
  0x1c   : > { %166 = sfence }
  0x1d   : > { %p190_p0 = scmp.lt.s32.totalorder %s539_s13, 1  ;;  %s205_s20 = sld [smem:[#allocation2 + %s539_s13]]  ;;  %v509_v0 = vmov 0.0|0.0   ;;  %vm510_vm0 = vmmov 0   ;;  %v511_v1 = vmov 0.0   ;;  %vm225_vm1 = vcmask 130048  }
  0x1e   : > { %445 = vmatprep.subr.bf16.mxu0 %v509_v0  ;;  %442 = vmatprep.mubr.msk.f32.mxu0 %vm510_vm0, %v511_v1  ;;  %v512_v23 = vmov 1.0   ;;  %v312_v31 = vlaneseq }
  0x1f   : > { %s595_s13 = smov (!%p190_p0, %s539_s13), 1 }
  0x20   : > { %s428_s21 = sshll.u32 %s595_s13, 4  ;;  %s429_s25 = sshll.u32 %s595_s13, 2  ;;  %v313_v32 = vshrl.u32 %v312_v31, 7  ;;  %v322_v39 = vand.u32 127, %v312_v31 }
  0x21   : > { %s194_s24 = scalar_lea.vmem %s589_s0, %s428_s21  ;;  %s199_s28 = scalar_lea.vmem %s590_s1, %s429_s25 }
  0x22   : > { %v206_v2 = vld [vmem:[%s194_s24] sm:$0xff]  ;;  %v207_v3 = vld [vmem:[%s194_s24 + $0x8] sm:$0xff]  ;;  %v314_v34 = vsub.s32 0, %v313_v32  ;;  %v320_v38 = vadd.s32 8, %v313_v32  ;;  %vm323_vm2 = vcmp.eq.s32.totalorder %v313_v32, %v322_v39  ;;  %s204_s4 = scalar_lea.vmem %s592_s3, %s428_s21 }
  0x23   : > { %v216_v4 = vstv %s205_s20  ;;  %v214_v5 = vsub.f32 0.0, %v206_v2  ;;  %v215_v6 = vsub.f32 0.0, %v207_v3  ;;  %v432_v11 = vld [vmem:[%s199_s28] sm:$0xf]  }
  0x24   : > { %v433_v12 = vunpack.c.0.s8 %v432_v11  ;;  %v434_v13 = vunpack.c.1.s8 %v432_v11  ;;  %vm324_vm3 = vcmp.eq.s32.totalorder %v320_v38, %v322_v39 }
  0x25   : > { %v217_v7 = vmul.f32 %v216_v4, %v214_v5  ;;  %v218_v8 = vmul.f32 %v216_v4, %v215_v6 }
  0x26   : > { %v212_v14 = vcvt.s32.f32 %v433_v12  ;;  %v213_v15 = vcvt.s32.f32 %v434_v13 }
  0x27   : > { %v219_v9 = vmul.f32 1.442695, %v217_v7  ;;  %v221_v10 = vmul.f32 1.442695, %v218_v8 }
  0x29   : > { %471 = vpow2.f32 %v219_v9 }
  0x2a   : > { %473 = vpow2.f32 %v221_v10 }
  0x33   : > { %v472_v16 = vpop.eup %471 }
  0x34   : > { %v474_v17 = vpop.eup %473  ;;  %v223_v18 = vmul.f32 %v472_v16, %v212_v14 }
  0x35   : > { %v224_v19 = vmul.f32 %v474_v17, %v213_v15 }
  0x36   : > { %v226_v20 = vsel %vm225_vm1, %v223_v18, 0.0 }
  0x37   : > { %v446_v21 = vpack.c.bf16 %v224_v19, %v223_v18  ;;  %227 = vadd.xlane.f32.xlu0 %v226_v20  ;;  %v229_v22 = vsel %vm225_vm1, %v224_v19, 0.0 }
  0x39   : > { %447 = vmatpush3.bf16.msra.mxu0 %v446_v21 }
  0x3b   : > { %230 = vadd.xlane.f32.xlu0 %v229_v22 }
  0x3c   : > { %443 = vmatmul.mubr.msk.f32.vlgmr.msra.gmra.mrb[0].mxu0 %vm225_vm1, %v512_v23 }
  0xc4   : > { %v228_v24 = vpop.xlane.xlu0 %227 }
  0xc5   : > { %v232_v27 = vadd.f32 1e-08, %v228_v24 }
  0xc8   : > { %v231_v25 = vpop.xlane.xlu0 %230 }
  0xc9   : > { %v233_v26 = vadd.f32 1e-08, %v231_v25 }
  0xcb   : > { %475 = vrsqrt.f32 %v233_v26 }
  0xcc   : > { %477 = vrsqrt.f32 %v232_v27 }
  0xd5   : > { %v476_v33 = vpop.eup %475 }
  0xd6   : > { %v478_v35 = vpop.eup %477  ;;  %v237_v36 = vmul.f32 %v476_v33, %v224_v19 }
  0xd7   : > { %v236_v40 = vmul.f32 %v478_v35, %v223_v18 }
 0x10f   : > { %v307_v28 = vpop.f32.mrb[0].mxu0 }
 0x110   : > { %v308_v29 = vadd.f32 1e-08, %v307_v28  ;;  %v444_v30 = vpop.f32.mrb[1].mxu0 }
 0x112   : > { %479 = vrsqrt.f32 %v308_v29 }
 0x11c   : > { %v480_v37 = vpop.eup %479 }
 0x11d   : > { %v315_v41 = vrot.slane %v480_v37, %v314_v34 }
 0x11f   : > { %v316_v42 = vmul.f32 %v315_v41, %v236_v40  ;;  %v317_v43 = vmul.f32 %v315_v41, %v237_v36 }
 0x121   : > { %v325_v44 = vsub.f32 1.0, %v316_v42  ;;  %v327_v45 = vsub.f32 0.0, %v316_v42  ;;  %v326_v46 = vsub.f32 1.0, %v317_v43  ;;  %v328_v47 = vsub.f32 0.0, %v317_v43 }
 0x123   : > { %v329_v48 = vsel %vm323_vm2, %v325_v44, %v327_v45  ;;  %v330_v49 = vsel %vm324_vm3, %v326_v46, %v328_v47 }
 0x124   : > { %331 = vst.msk [vmem:[%s204_s4] sm:$0xff] %vm225_vm1, %v329_v48  ;;  %332 = vst.msk [vmem:[%s204_s4 + $0x8] sm:$0xff] %vm225_vm1, %v330_v49 }
 0x125 PF: > { %s14_s12 = sadd.s32 1, %s506_s12  }
 0x126   : > { %p11_p1 = scmp.ge.s32.totalorder %s14_s12, 4  }
 0x128   :  { %13 = sbr.rel (!%p11_p1) target bundleno = 1 (0x1), region = 70 }
 0x12f   :  { %354 = vsyncpa [#allocation3], 1 }
 0x130   :  { %356 = vsyncpa [#allocation3 + $0x1], 1 }

// kernel: custom-call.24
= control target key start
LH: loop header
LB: loop body
LE: loop exit
PB: predicated region body
PF: predicated region fallthrough
CT: control target
= control target key end

     0   :  { %5 = vsyncpa [#allocation3], 0  ;;  %s874_s0 = inlined_call_operand.vmem [shape: f32[8,8,8], index: 0, kind: input, shape index: {}]   ;;  %s875_s1 = inlined_call_operand.vmem [shape: f32[8,8,8], index: 1, kind: output, shape index: {0}]   ;;  %s876_s2 = inlined_call_operand.hbm [shape: s32[8,8], index: 2, kind: output, shape index: {1}]   ;;  %s877_s3 = inlined_call_operand.vmem [shape: s32[8,8], index: 3, kind: output, shape index: {2}]  }
   0x1   :  { %7 = vsyncpa [#allocation3 + $0x1], 0  ;;  %s696_s12 = smov 0   ;;  %s698_s13 = smov 0  }
   0x2   :  { %s700_s14 = smov 0   ;;  %s702_s15 = smov 0  }
   0x3 LB: > { %s717_s16 = sadd.s32 4294967295, %s668_s15   ;;  %s531_s17 = sadd.s32 4294967294, %s668_s15   ;;  %s668_s15 = sphi %s702_s15, %s883_s15   ;;  %s664_s14 = sphi %s700_s14, %s882_s14   ;;  %s660_s13 = sphi %s698_s13, %s881_s13   ;;  %s656_s12 = sphi %s696_s12, %s880_s12  }
   0x4   : > { %s721_s18 = sadd.s32 1, %s668_s15   ;;  %s17_s19 = sshrl.u32 %s668_s15, 3 }
   0x5   : > { %s18_s20 = sshrl.u32 %s721_s18, 3  ;;  %s22_s21 = sadd.s32 1, %s664_s14 }
   0x6   : > { %s19_s22 = ssub.s32 %s17_s19, %s18_s20  ;;  %p32_p0 = scmp.ne.s32.totalorder %s664_s14, %s660_s13 }
   0x7   : > { %p20_p1 = scmp.eq.s32.totalorder %s19_s22, 0  ;;  %p33_p2 = scmp.eq.s32.totalorder %s717_s16, 7 }
   0x8   : > { %p38_p3 = scmp.ne.s32.totalorder %s660_s13, %s656_s12  ;;  %p39_p4 = scmp.eq.s32.totalorder %s531_s17, 7 }
   0x9   : > { %s732_s23 = scalar_select %p20_p1, %s664_s14, %s22_s21  }
   0xa   : > { %p734_p5 = por %p33_p2, %p32_p0  ;;  %p738_p6 = por %p39_p4, %p38_p3 }
   0xb   : > { %p533_p7 = scmp.ge.s32.totalorder %s668_s15, 8 }
   0xc   : > { %s85_s26 = sand.u32 (!%p533_p7), 1, %s668_s15   ;;  %s535_s27 = sshll.u32 (!%p533_p7), %s668_s15, 3 }
   0xd   : > { %83 = sbr.rel (%p533_p7) target bundleno = 20 (0x14), region = 16  ;;  %s534_s28 = sshll.u32 (!%p533_p7), %s85_s26, 3 }
   0xe   : > { %s89_s4 = scalar_lea.vmem (!%p533_p7), %s874_s0, %s535_s27  ;;  %s87_s5 = scalar_lea.vmem (!%p533_p7), [#allocation0], %s534_s28 }
   0xf   : > { %v117_v0 = vld [vmem:[%s89_s4] sm:$0xff] (!%p533_p7) }
  0x10   : > { %118 = vst [vmem:[%s87_s5] sm:$0xff] (!%p533_p7), %v117_v0 }
  0x14 PF: > { %p536_p8 = scmp.ge.s32.totalorder %s668_s15, 1  ;;  %p123_p9 = scmp.lt.s32.totalorder %s668_s15, 9 }
  0x16   : > { %p124_p10 = pnand %p536_p8, %p123_p9 }
  0x18   : > { %127 = sbr.rel (%p124_p10) target bundleno = 433 (0x1b1), region = 54 }
  0x1f   : > { %s130_s6 = sand.u32 1, %s717_s16   ;;  %s145_s7 = sand.u32 1, %s660_s13   ;;  %v163_v1 = vlaneseq  ;;  %v674_v4 = vmov 0  }
  0x20   : > { %s537_s8 = sshll.u32 %s130_s6, 3  ;;  %s754_s9 = sshll.u32 %s145_s7, 3 }
  0x21   : > { %v757_v2 = vshrl.u32 %v163_v1, 7  ;;  %s132_s10 = scalar_lea.vmem [#allocation0], %s537_s8  ;;  %s759_s11 = scalar_lea.vmem [#allocation1], %s537_s8 }
  0x22   : > { %v156_v3 = vld [vmem:[%s132_s10] sm:$0xff]  ;;  %s158_s17 = sand.u32 7, %s717_s16   ;;  %s147_s19 = scalar_lea.vmem [#allocation2], %s754_s9 }
  0x23   : > { %157 = vst [vmem:[%s759_s11] sm:$0xff] %v156_v3  ;;  %167 = vst [vmem:[#allocation5] sm:$0xff] %v757_v2  ;;  %s767_s20 = scalar_lea.vmem %s147_s19, %s158_s17 [#allocation2]  ;;  %s153_s21 = scalar_lea.vmem [#allocation4], %s754_s9 }
  0x24   : > { %s772_s22 = scalar_lea.vmem %s153_s21, %s158_s17 [#allocation4]  ;;  %162 = vst [vmem:[%s767_s20] sm:$0x1] %v674_v4  ;;  %s775_s26 = smov 0  }
  0x25 LB: >> { %v782_v7 = vstv %s672_s26  ;;  %s224_s27 = ssub.s32 128, %s672_s26  ;;  %v230_v37 = vand.u32 127, %v163_v1  ;;  %s236_s28 = scalar_lea.vmem %s759_s11, %s672_s26 [#allocation1]  ;;  %s672_s26 = sphi %s775_s26, %s173_s26  }
  0x26   : >> { %vm182_vm0 = vcmp.ge.s32.totalorder %v757_v2, %v782_v7  ;;  %s242_s30 = scalar_lea.vmem [#allocation5], %s672_s26  ;;  %vm262_vm13 = vcmp.gt.s32.totalorder %v757_v2, %v782_v7  ;;  %s173_s26 = sadd.s32 1, %s672_s26  }
  0x27   : >> { %vm254_vm10 = vcmp.gt.s32.totalorder %v230_v37, %v782_v7  ;;  %vm231_vm11 = vcmp.eq.s32.totalorder %v230_v37, %v782_v7  ;;  %p170_p11 = scmp.ge.s32.totalorder %s173_s26, 8  }
  0x28   : >> { %vm266_vm15 = vmand %vm262_vm13, %vm231_vm11  ;;  %s545_s6 = sshll.u32 (%p170_p11), %s717_s16, 3  ;;  %s372_s8 = sshrl.u32 (%p170_p11), %s717_s16, 3 }
  0x29   : > { %s546_s26 = sshll.u32 (%p170_p11), %s372_s8, 7 }
  0x2a   : >> { %v178_v5 = vld [vmem:[%s759_s11] sm:$0xff]  ;;  %v238_v40 = vld [vmem:[%s236_s28] ss:$0 sm:$0xff] }
  0x2b   : >> { %v179_v6 = vand.u32 2147483647, %v178_v5  ;;  %v233_v39 = vld [vmem:[%s767_s20] ss:$0 sm:$0xff] }
  0x2c   : >> { %v244_v41 = vld [vmem:[%s242_s30] ss:$0 sm:$0xff] }
  0x2d   : >> { %vm541_vm1 = vcmp.gt.f32.partialorder %v179_v6, -inf }
  0x2e   : >> { %vm186_vm2 = vmand %vm182_vm0, %vm541_vm1 }
  0x2f   : >> { %v187_v8 = vsel %vm186_vm2, %v757_v2, %v782_v7  ;;  %v188_v9 = vsel %vm186_vm2, %v179_v6, -inf }
  0x30   : >> { %v189_v10 = vrot.slane %v188_v9, 1  ;;  %v190_v11 = vrot.slane %v187_v8, 1 }
  0x32   : >> { %vm191_vm3 = vcmp.ge.f32.partialorder %v189_v10, %v188_v9  ;;  %v194_v12 = vrot.slane %v189_v10, 1  ;;  %v195_v13 = vrot.slane %v190_v11, 1 }
  0x33   : >> { %v192_v14 = vsel %vm191_vm3, %v189_v10, %v188_v9  ;;  %v193_v15 = vsel %vm191_vm3, %v190_v11, %v187_v8 }
  0x34   : >> { %vm196_vm4 = vcmp.ge.f32.partialorder %v194_v12, %v192_v14  ;;  %v199_v16 = vrot.slane %v194_v12, 1  ;;  %v200_v17 = vrot.slane %v195_v13, 1 }
  0x35   : >> { %v197_v18 = vsel %vm196_vm4, %v194_v12, %v192_v14  ;;  %v198_v19 = vsel %vm196_vm4, %v195_v13, %v193_v15 }
  0x36   : >> { %vm201_vm5 = vcmp.ge.f32.partialorder %v199_v16, %v197_v18  ;;  %v204_v20 = vrot.slane %v199_v16, 1  ;;  %v205_v21 = vrot.slane %v200_v17, 1 }
  0x37   : >> { %v202_v22 = vsel %vm201_vm5, %v199_v16, %v197_v18  ;;  %v203_v23 = vsel %vm201_vm5, %v200_v17, %v198_v19 }
  0x38   : >> { %vm206_vm6 = vcmp.ge.f32.partialorder %v204_v20, %v202_v22  ;;  %v209_v24 = vrot.slane %v204_v20, 1  ;;  %v210_v25 = vrot.slane %v205_v21, 1 }
  0x39   : >> { %v207_v26 = vsel %vm206_vm6, %v204_v20, %v202_v22  ;;  %v208_v27 = vsel %vm206_vm6, %v205_v21, %v203_v23 }
  0x3a   : >> { %vm211_vm7 = vcmp.ge.f32.partialorder %v209_v24, %v207_v26  ;;  %v214_v28 = vrot.slane %v209_v24, 1  ;;  %v215_v29 = vrot.slane %v210_v25, 1 }
  0x3b   : >> { %v212_v30 = vsel %vm211_vm7, %v209_v24, %v207_v26  ;;  %v213_v31 = vsel %vm211_vm7, %v210_v25, %v208_v27 }
  0x3c   : >> { %vm216_vm8 = vcmp.ge.f32.partialorder %v214_v28, %v212_v30  ;;  %v219_v32 = vrot.slane %v214_v28, 1  ;;  %v220_v33 = vrot.slane %v215_v29, 1 }
  0x3d   : >> { %v217_v34 = vsel %vm216_vm8, %v214_v28, %v212_v30  ;;  %v218_v35 = vsel %vm216_vm8, %v215_v29, %v213_v31 }
  0x3e   : >> { %vm221_vm9 = vcmp.ge.f32.partialorder %v219_v32, %v217_v34 }
  0x3f   : >> { %v223_v36 = vsel %vm221_vm9, %v220_v33, %v218_v35 }
  0x40   : >> { %225 = vrot.lane.b32.xlu0 %v223_v36, %s224_s27  ;;  %s336_s27 = scalar_lea.vmem (%p170_p11), %s875_s1, %s545_s6  ;;  %s675_s6 = smov (%p170_p11), [#allocation2]  }
  0xb2   : >> { %v226_v38 = vpop.permute.xlu0 %225 }
  0xb3   : >> { %550 = vpush %v226_v38 }
  0xe4   : >> { %s551_s29 = spop %550 }
  0xe5   : >> { %v232_v42 = vstv %s551_s29  ;;  %s237_s4 = scalar_lea.vmem %s759_s11, %s551_s29 [#allocation1]  ;;  %s243_s5 = scalar_lea.vmem [#allocation5], %s551_s29 }
  0xe6   : >> { %v239_v43 = vld [vmem:[%s237_s4] ss:$0 sm:$0xff]  ;;  %v234_v45 = vsel %vm231_vm11, %v232_v42, %v233_v39 }
  0xe7   : >> { %v245_v44 = vld [vmem:[%s243_s5] ss:$0 sm:$0xff]  ;;  %240 = vst [vmem:[%s237_s4] sm:$0x1] %v238_v40  ;;  %vm248_vm12 = vcmp.ne.f32.partialorder %v239_v43, 0.0  ;;  %235 = vst [vmem:[%s767_s20] sm:$0x1] %v234_v45  ;;  %v255_v52 = vsel %vm254_vm10, %v239_v43, 0.0 }
  0xe8   : >> { %246 = vst [vmem:[%s243_s5] sm:$0x1] %v244_v41  ;;  %241 = vst [vmem:[%s236_s28] sm:$0x1] %v239_v43  ;;  %s379_s20 = sshll.u32 (%p170_p11), %s147_s19, 4  ;;  %s327_s4 = scalar_lea.sflag (%p170_p11), [#allocation3], %s145_s7  ;;  %s380_s20 = int_to_ptr.vmem [resolvable:$true] %s379_s20 }
  0xe9   : >> { %247 = vst [vmem:[%s242_s30] sm:$0x1] %v245_v44  ;;  %vm249_vm14 = vmand %vm231_vm11, %vm248_vm12  ;;  %s826_s30 = scalar_lea.hbm (%p170_p11), %s876_s2, %s546_s26  ;;  %s602_s5 = scalar_lea.vmem (%p170_p11), %s380_s20, 128 }
  0xea   : >> { %v250_v46 = vsel %vm249_vm14, %v239_v43, 1.0  ;;  %p603_p12 = scmp.ne.s32.totalorder (%p170_p11), %s380_s20, %s602_s5 }
  0xeb   : >> { %v263_v47 = vsel %vm262_vm13, %v250_v46, 1.0 }
  0xec   : >> { %600 = vrcp.f32 %v263_v47  ;;  %p604_p13 = pnand (%p170_p11), %p603_p12, %p734_p5 }
  0xee   : > { %p605_p0 = pneg (%p170_p11), %p604_p13 }
  0xef   : >> { %v259_v49 = vld [vmem:[%s759_s11] sm:$0xff] }
  0xf0   : > { %v273_v56 = vld [vmem:[#allocation5] sm:$0xff] (%p170_p11) }
  0xf6   : >> { %v601_v48 = vpop.eup %600 }
  0xf7   : >> { %v265_v50 = vmul.f32 %v601_v48, %v259_v49 }
  0xf9   : >> { %v267_v51 = vsel %vm266_vm15, %v265_v50, 0.0 }
  0xfa   : >> { %268 = vadd.xlane.f32.xlu0 %v267_v51 }
 0x127   : > { %289 = vxpose.xlu0.b32.start.end [1/1] (short) (narrow) (%p170_p11), %v273_v56, 8 }
 0x186   : > { %172 = sbr.rel (!%p170_p11) target bundleno = 37 (0x25), region = 214 }
 0x187   : >> { %v269_v53 = vpop.xlane.xlu0 %268 }
 0x188   : >> { %v270_v54 = vmul.f32 %v269_v53, %v255_v52 }
 0x18a   : >> { %v271_v55 = vsub.f32 %v265_v50, %v270_v54 }
 0x18c   : >> { %272 = vst [vmem:[%s759_s11] sm:$0xff] %v271_v55 }
 0x193   : > { %v364_v57 = vld [vmem:[%s759_s11] sm:$0xff]  ;;  %s606_s11 = sshll.u32 %s675_s6, 4  ;;  %s607_s11 = int_to_ptr.vmem [resolvable:$false] %s606_s11 }
 0x194   : > { %365 = vst [vmem:[%s336_s27] sm:$0xff] %v364_v57  ;;  %s608_s10 = scalar_lea.vmem %s607_s11, 256  ;;  %p609_p1 = scmp.lt.s32.totalorder %s380_s20, %s607_s11 }
 0x195   : > { %p610_p2 = scmp.lt.s32.totalorder %s608_s10, %s602_s5 }
 0x197   : > { %p611_p3 = por %p610_p2, %p609_p1 }
 0x199   : > { %p612_p4 = pnand %p611_p3, %p605_p0 }
 0x19b   : > { %615 = shalt.err (!%p612_p4)
}
 0x19c   : > { %s616_s7 = scalar_lea.hbm %s826_s30, 128  ;;  %s620_s27 = scalar_lea.hbm %s876_s2, 128 }
 0x19d   : > { %p617_p7 = scmp.ne.s32.totalorder %s826_s30, %s616_s7  ;;  %p621_p10 = scmp.lt.u32.totalorder %s826_s30, %s876_s2 }
 0x19e   : > { %p622_p11 = scmp.lt.u32.totalorder %s620_s27, %s616_s7  ;;  %p624_p13 = scmp.lt.u32.totalorder %s616_s7, %s826_s30 }
 0x19f   : > { %p618_p8 = pnand %p617_p7, %p734_p5 }
 0x1a0   : > { %p623_p12 = por %p622_p11, %p621_p10 }
 0x1a1   : > { %p619_p9 = pneg %p618_p8 }
 0x1a2   : > { %p625_p0 = por %p624_p13, %p623_p12 }
 0x1a4   : > { %p626_p1 = pnand %p625_p0, %p619_p9 }
 0x1a6   : > { %629 = shalt.err (!%p626_p1)
}
 0x1a7   : > { %552 = dma.vmem_to_hbm [thread:$0]  (%p734_p5), %s380_s20, 128, %s826_s30, %s327_s4   ;;  %v305_v58 = vpop.trf.xlu0 }
 0x1a8   : > { %321 = vst [vmem:[%s772_s22] sm:$0x1] %v305_v58  ;;  %385 = sbr.rel (!%p734_p5) target bundleno = 433 (0x1b1), region = 104  ;;  %s547_s29 = sshll.u32 (%p734_p5), %s372_s8, 3 }
 0x1a9   : > { %s388_s11 = scalar_lea.vmem (%p734_p5), %s877_s3, %s547_s29 }
 0x1af   : > { %v416_v59 = vld [vmem:[%s153_s21] sm:$0xff] }
 0x1b0   : > { %417 = vst [vmem:[%s388_s11] sm:$0xff] %v416_v59 }
 0x1b1 PF: > { %p558_p2 = scmp.ge.s32.totalorder %s668_s15, 2  ;;  %s433_s22 = sand.u32 1, %s656_s12  }
 0x1b2   : > { %s434_s24 = scalar_lea.sflag [#allocation3], %s433_s22 }
 0x1b3   : > { %p555_p5 = pnand %p558_p2, %p738_p6 }
 0x1b5   : > { %651 = dma.done.wait (!%p555_p5), %s434_s24, 128  }
 0x1b6   : > { %653 = vsyncadd (!%p555_p5), %s434_s24, 4294967168  ;;  %p10_p3 = scmp.ge.s32.totalorder %s721_s18, 10   ;;  %s880_s12 = smov %s660_s13 }
 0x1b7   : > { %s881_s13 = smov %s664_s14  ;;  %s882_s14 = smov %s732_s23 }
 0x1b8   : > { %s883_s15 = smov %s721_s18  ;;  %12 = sbr.rel (!%p10_p3) target bundleno = 3 (0x3), region = 225 }
 0x1bf   :  { %446 = vsyncpa [#allocation3], 1 }
 0x1c0   :  { %448 = vsyncpa [#allocation3 + $0x1], 1 }

// kernel: _lambda_.6
= control target key start
LH: loop header
LB: loop body
LE: loop exit
PB: predicated region body
PF: predicated region fallthrough
CT: control target
= control target key end

     0   :  { %vm17_vm0 = vcmask 261120   ;;  %vm180_vm2 = vcmask 130048   ;;  %s280_s1 = inlined_call_operand.vmem [shape: f32[32,32], index: 1, kind: input, shape index: {}]   ;;  %s281_s0 = inlined_call_operand.vmem [shape: f32[16,32], index: 0, kind: input, shape index: {}]   ;;  %s282_s2 = inlined_call_operand.vmem [shape: f32[16,16], index: 2, kind: output, shape index: {}]  }
   0x1   :  { %v13_v0 = vld [vmem:[%s280_s1] sm:$0xff]  ;;  %v14_v1 = vld [vmem:[%s280_s1 + $0x8] sm:$0xff]  ;;  %v15_v2 = vld [vmem:[%s280_s1 + $0x10] sm:$0xff] }
   0x2   :  { %v221_v3 = vpack.c.bf16 %v14_v1, %v13_v0  ;;  %v16_v4 = vld [vmem:[%s280_s1 + $0x18] sm:$0xff]  ;;  %v11_v5 = vld [vmem:[%s281_s0] sm:$0xff]  ;;  %v12_v7 = vld [vmem:[%s281_s0 + $0x8] sm:$0xff] }
   0x3   :  { %v225_v6 = vpack.c.bf16 %v16_v4, %v15_v2  ;;  %211 = vmatprep.mubr.msk.f32.mxu0 %vm17_vm0, %v11_v5  ;;  %vm230_vm1 = vmpackc.low %vm17_vm0, %vm17_vm0 }
   0x4   :  { %222 = vmatprep.subr.bf16.mxu0 %v221_v3 }
   0x5   :  { %224 = vmatpush3.bf16.msra.mxu0 %v221_v3 }
   0x6   :  { %226 = vmatprep.subr.bf16.mxu0 %v225_v6 }
   0x9   :  { %228 = vmatpush3.bf16.msra.mxu0 %v225_v6 }
   0xc   :  { %212 = vmatmul.mubr.msk.f32.vlgmr.msra.gmra.mrb[0].mxu0 %vm17_vm0, %v12_v7 }
  0xdf   :  { %v213_v8 = vpop.f32.mrb[0].mxu0 }
  0xe0   :  { %v90_v9 = vpop.f32.mrb[1].mxu0 }
  0xe1   :  { %v229_v10 = vpack.c.bf16 %v213_v8, %v90_v9  ;;  %218 = vmatprep.mubr.msk.f32.mxu1 %vm17_vm0, %v90_v9 }
  0xe3   :  { %231 = vmatprep.subr.msk.bf16.mxu1 %vm230_vm1, %v229_v10 }
  0xe4   :  { %234 = vmatpush3.bf16.xpose.msk.msra.mxu1 %vm230_vm1, %v229_v10 }
  0xeb   :  { %219 = vmatmul.mubr.msk.f32.vlgmr.msra.gmra.mrb[0].mxu1 %vm17_vm0, %v213_v8 }
 0x1be   :  { %v220_v11 = vpop.f32.mrb[0].mxu1 }
 0x1bf   :  { %182 = vst.msk [vmem:[%s282_s2 + $0x8] sm:$0xff] %vm180_vm2, %v220_v11  ;;  %v171_v12 = vpop.f32.mrb[1].mxu1 }
 0x1c0   :  { %181 = vst.msk [vmem:[%s282_s2] sm:$0xff] %vm180_vm2, %v171_v12 }

// kernel: custom-call.26
= control target key start
LH: loop header
LB: loop body
LE: loop exit
PB: predicated region body
PF: predicated region fallthrough
CT: control target
= control target key end

     0   :  { %s385_s6 = smov 0   ;;  %s387_s7 = smov 0   ;;  %s443_s0 = inlined_call_operand.vmem [shape: f32[8,1,8,8], index: 0, kind: input, shape index: {}]   ;;  %s444_s1 = inlined_call_operand.vmem [shape: f32[8,1,8,8], index: 1, kind: output, shape index: {}]  }
   0x1   :  { %s389_s8 = smov 0  }
   0x2 LB: > { %s311_s9 = sadd.s32 4294967295, %s372_s8   ;;  %s33_s10 = sadd.s32 1, %s368_s7  ;;  %s372_s8 = sphi %s389_s8, %s7_s8   ;;  %s368_s7 = sphi %s387_s7, %s446_s7   ;;  %s364_s6 = sphi %s385_s6, %s445_s6  }
   0x3   : > { %p35_p0 = scmp.ge.s32.totalorder %s33_s10, 8  ;;  %p313_p1 = scmp.ge.s32.totalorder %s372_s8, 8 }
   0x4   : > { %s49_s11 = sand.u32 (!%p313_p1), 1, %s372_s8   ;;  %s315_s12 = sshll.u32 (!%p313_p1), %s368_s7, 3 }
   0x5   : > { %s448_s10 = smov (%p35_p0, %s33_s10), 0  ;;  %47 = sbr.rel (%p313_p1) target bundleno = 12 (0xc), region = 16 }
   0x6   : > { %s314_s13 = sshll.u32 (!%p313_p1), %s49_s11, 3  ;;  %s56_s16 = scalar_lea.vmem (!%p313_p1), %s443_s0, %s315_s12 }
   0x7   : > { %v84_v0 = vld [vmem:[%s56_s16] sm:$0xff] (!%p313_p1)  ;;  %s51_s17 = scalar_lea.vmem (!%p313_p1), [#allocation0], %s314_s13 }
   0x8   : > { %85 = vst [vmem:[%s51_s17] sm:$0xff] (!%p313_p1), %v84_v0 }
   0xc PF: > { %p316_p2 = scmp.ge.s32.totalorder %s372_s8, 1  ;;  %p90_p3 = scmp.lt.s32.totalorder %s372_s8, 9 }
   0xe   : > { %p91_p4 = pnand %p316_p2, %p90_p3 }
  0x10   : > { %94 = sbr.rel (%p91_p4) target bundleno = 1213 (0x4bd), region = 54 }
  0x17   : > { %s97_s18 = sand.u32 1, %s311_s9   ;;  %v108_v1 = vlaneseq  ;;  %v374_v10 = vmov -1.0   ;;  %s320_s21 = sshll.u32 %s364_s6, 3 }
  0x18   : > { %s317_s19 = sshll.u32 %s97_s18, 3  ;;  %s219_s24 = scalar_lea.vmem %s444_s1, %s320_s21 }
  0x19   : > { %v412_v2 = vand.u32 127, %v108_v1  ;;  %v112_v3 = vshrl.u32 %v108_v1, 7  ;;  %s99_s20 = scalar_lea.vmem [#allocation0], %s317_s19 }
  0x1a   : > { %v115_v4 = vld [vmem:[%s99_s20] sm:$0xff] }
  0x1b   : > { %vm110_vm0 = vcmp.lt.s32.totalorder %v412_v2, 8  ;;  %vm114_vm1 = vcmp.eq.s32.totalorder %v112_v3, %v412_v2  ;;  %vm119_vm2 = vcmp.ge.s32.totalorder %v112_v3, %v412_v2  ;;  %vm133_vm4 = vcmp.eq.s32.totalorder %v412_v2, 0 }
  0x1c   : > { %v116_v5 = vsel %vm114_vm1, %v115_v4, 0.0  ;;  %vm120_vm3 = vmand %vm119_vm2, %vm110_vm0  ;;  %vm130_vm5 = vcmp.eq.s32.totalorder %v412_v2, %v112_v3  ;;  %v134_v11 = vsel %vm133_vm4, 1.0, %v374_v10  ;;  %vm141_vm6 = vcmp.eq.s32.totalorder %v412_v2, 1 }
  0x1d   : > { %v121_v6 = vsel %vm120_vm3, %v115_v4, 0.0  ;;  %117 = vadd.xlane.f32.xlu0 %v116_v5  ;;  %v135_v12 = vsel %vm130_vm5, %v134_v11, 0.0  ;;  %vm151_vm7 = vcmp.eq.s32.totalorder %v412_v2, 2  ;;  %vm161_vm8 = vcmp.eq.s32.totalorder %v412_v2, 3 }
  0x1e   : > { %vm171_vm9 = vcmp.eq.s32.totalorder %v412_v2, 4  ;;  %vm181_vm10 = vcmp.eq.s32.totalorder %v412_v2, 5  ;;  %vm191_vm11 = vcmp.eq.s32.totalorder %v412_v2, 6  ;;  %vm201_vm12 = vcmp.eq.s32.totalorder %v412_v2, 7 }
  0xaa   : > { %v417_v7 = vpop.xlane.xlu0 %117 }
  0xab   : > { %348 = vrcp.f32 %v417_v7  ;;  %vm208_vm13 = vweird.f32 %v417_v7 }
  0xb5   : > { %v349_v8 = vpop.eup %348 }
  0xb6   : > { %v123_v9 = vmul.f32 %v349_v8, %v121_v6 }
  0xb8   : > { %124 = vst [vmem:[#allocation2] sm:$0xff] %v123_v9 }
  0xbf   : > { %v137_v13 = vld [vmem:[#allocation2 + $0x1] ss:$0 sm:$0xff]  ;;  %v147_v16 = vld [vmem:[#allocation2 + $0x2] ss:$0 sm:$0xff]  ;;  %v157_v21 = vld [vmem:[#allocation2 + $0x3] ss:$0 sm:$0xff] }
  0xc0   : > { %v138_v14 = vxor.u32 2147483648, %v137_v13  ;;  %v148_v18 = vxor.u32 2147483648, %v147_v16  ;;  %v158_v23 = vxor.u32 2147483648, %v157_v21  ;;  %v167_v26 = vld [vmem:[#allocation2 + $0x4] ss:$0 sm:$0xff] }
  0xc1   : > { %v168_v28 = vxor.u32 2147483648, %v167_v26  ;;  %v177_v31 = vld [vmem:[#allocation2 + $0x5] ss:$0 sm:$0xff]  ;;  %v187_v36 = vld [vmem:[#allocation2 + $0x6] ss:$0 sm:$0xff] }
  0xc2   : > { %v142_v15 = vmul.f32 %v138_v14, %v135_v12  ;;  %v178_v33 = vxor.u32 2147483648, %v177_v31  ;;  %v188_v38 = vxor.u32 2147483648, %v187_v36  ;;  %v197_v41 = vld [vmem:[#allocation2 + $0x7] ss:$0 sm:$0xff] }
  0xc3   : > { %v198_v43 = vxor.u32 2147483648, %v197_v41 }
  0xc4   : > { %143 = vadd.xlane.f32.xlu0 %v142_v15 }
 0x151   : > { %v144_v17 = vpop.xlane.xlu0 %143 }
 0x152   : > { %v145_v19 = vsel %vm141_vm6, %v144_v17, %v135_v12 }
 0x153   : > { %v152_v20 = vmul.f32 %v148_v18, %v145_v19 }
 0x155   : > { %153 = vadd.xlane.f32.xlu1 %v152_v20 }
 0x1e2   : > { %v154_v22 = vpop.xlane.xlu1 %153 }
 0x1e3   : > { %v155_v24 = vsel %vm151_vm7, %v154_v22, %v145_v19 }
 0x1e4   : > { %v162_v25 = vmul.f32 %v158_v23, %v155_v24 }
 0x1e6   : > { %163 = vadd.xlane.f32.xlu1 %v162_v25 }
 0x273   : > { %v164_v27 = vpop.xlane.xlu1 %163 }
 0x274   : > { %v165_v29 = vsel %vm161_vm8, %v164_v27, %v155_v24 }
 0x275   : > { %v172_v30 = vmul.f32 %v168_v28, %v165_v29 }
 0x277   : > { %173 = vadd.xlane.f32.xlu0 %v172_v30 }
 0x304   : > { %v174_v32 = vpop.xlane.xlu0 %173 }
 0x305   : > { %v175_v34 = vsel %vm171_vm9, %v174_v32, %v165_v29 }
 0x306   : > { %v182_v35 = vmul.f32 %v178_v33, %v175_v34 }
 0x308   : > { %183 = vadd.xlane.f32.xlu1 %v182_v35 }
 0x395   : > { %v184_v37 = vpop.xlane.xlu1 %183 }
 0x396   : > { %v185_v39 = vsel %vm181_vm10, %v184_v37, %v175_v34 }
 0x397   : > { %v192_v40 = vmul.f32 %v188_v38, %v185_v39 }
 0x399   : > { %193 = vadd.xlane.f32.xlu0 %v192_v40 }
 0x426   : > { %v194_v42 = vpop.xlane.xlu0 %193 }
 0x427   : > { %v195_v44 = vsel %vm191_vm11, %v194_v42, %v185_v39 }
 0x428   : > { %v202_v45 = vmul.f32 %v198_v43, %v195_v44 }
 0x42a   : > { %203 = vadd.xlane.f32.xlu1 %v202_v45 }
 0x4b7   : > { %v204_v46 = vpop.xlane.xlu1 %203 }
 0x4b8   : > { %v205_v47 = vsel %vm201_vm12, %v204_v46, %v195_v44 }
 0x4b9   : > { %v207_v48 = vmul.f32 %v349_v8, %v205_v47 }
 0x4bb   : > { %v209_v49 = vsel %vm208_vm13, %v205_v47, %v207_v48 }
 0x4bc   : > { %248 = vst [vmem:[%s219_s24] sm:$0xff] %v209_v49 }
 0x4bd PF: > { %s7_s8 = sadd.s32 1, %s372_s8   ;;  %s445_s6 = smov %s368_s7 }
 0x4be   : > { %p4_p5 = scmp.ge.s32.totalorder %s7_s8, 10   ;;  %s446_s7 = smov %s448_s10 }
 0x4c0   :  { %6 = sbr.rel (!%p4_p5) target bundleno = 2 (0x2), region = 125 }

// kernel: custom-call.25
= control target key start
LH: loop header
LB: loop body
LE: loop exit
PB: predicated region body
PF: predicated region fallthrough
CT: control target
= control target key end

     0   :  { %s384_s6 = smov 0   ;;  %s386_s7 = smov 0   ;;  %s442_s0 = inlined_call_operand.vmem [shape: f32[8,1,8,8], index: 0, kind: input, shape index: {}]   ;;  %s443_s1 = inlined_call_operand.vmem [shape: f32[8,1,8,8], index: 1, kind: output, shape index: {}]  }
   0x1   :  { %s388_s8 = smov 0  }
   0x2 LB: > { %s310_s9 = sadd.s32 4294967295, %s371_s8   ;;  %s33_s10 = sadd.s32 1, %s367_s7  ;;  %s371_s8 = sphi %s388_s8, %s7_s8   ;;  %s367_s7 = sphi %s386_s7, %s445_s7   ;;  %s363_s6 = sphi %s384_s6, %s444_s6  }
   0x3   : > { %p35_p0 = scmp.ge.s32.totalorder %s33_s10, 8  ;;  %p312_p1 = scmp.ge.s32.totalorder %s371_s8, 8 }
   0x4   : > { %s49_s11 = sand.u32 (!%p312_p1), 1, %s371_s8   ;;  %s314_s12 = sshll.u32 (!%p312_p1), %s367_s7, 3 }
   0x5   : > { %s447_s10 = smov (%p35_p0, %s33_s10), 0  ;;  %47 = sbr.rel (%p312_p1) target bundleno = 12 (0xc), region = 16 }
   0x6   : > { %s313_s13 = sshll.u32 (!%p312_p1), %s49_s11, 3  ;;  %s56_s16 = scalar_lea.vmem (!%p312_p1), %s442_s0, %s314_s12 }
   0x7   : > { %v84_v0 = vld [vmem:[%s56_s16] sm:$0xff] (!%p312_p1)  ;;  %s51_s17 = scalar_lea.vmem (!%p312_p1), [#allocation0], %s313_s13 }
   0x8   : > { %85 = vst [vmem:[%s51_s17] sm:$0xff] (!%p312_p1), %v84_v0 }
   0xc PF: > { %p315_p2 = scmp.ge.s32.totalorder %s371_s8, 1  ;;  %p90_p3 = scmp.lt.s32.totalorder %s371_s8, 9 }
   0xe   : > { %p91_p4 = pnand %p315_p2, %p90_p3 }
  0x10   : > { %94 = sbr.rel (%p91_p4) target bundleno = 1213 (0x4bd), region = 54 }
  0x17   : > { %s97_s18 = sand.u32 1, %s310_s9   ;;  %v108_v1 = vlaneseq  ;;  %v373_v10 = vmov -1.0   ;;  %s319_s21 = sshll.u32 %s363_s6, 3 }
  0x18   : > { %s316_s19 = sshll.u32 %s97_s18, 3  ;;  %s218_s24 = scalar_lea.vmem %s443_s1, %s319_s21 }
  0x19   : > { %v411_v2 = vand.u32 127, %v108_v1  ;;  %v112_v3 = vshrl.u32 %v108_v1, 7  ;;  %s99_s20 = scalar_lea.vmem [#allocation0], %s316_s19 }
  0x1a   : > { %v115_v4 = vld [vmem:[%s99_s20] sm:$0xff] }
  0x1b   : > { %vm110_vm0 = vcmp.lt.s32.totalorder %v411_v2, 8  ;;  %vm114_vm1 = vcmp.eq.s32.totalorder %v112_v3, %v411_v2  ;;  %vm119_vm2 = vcmp.le.s32.totalorder %v112_v3, %v411_v2  ;;  %vm133_vm4 = vcmp.eq.s32.totalorder %v411_v2, 7 }
  0x1c   : > { %v116_v5 = vsel %vm114_vm1, %v115_v4, 0.0  ;;  %vm120_vm3 = vmand %vm119_vm2, %vm110_vm0  ;;  %vm130_vm5 = vcmp.eq.s32.totalorder %v411_v2, %v112_v3  ;;  %v134_v11 = vsel %vm133_vm4, 1.0, %v373_v10  ;;  %vm141_vm6 = vcmp.eq.s32.totalorder %v411_v2, 6 }
  0x1d   : > { %v121_v6 = vsel %vm120_vm3, %v115_v4, 0.0  ;;  %117 = vadd.xlane.f32.xlu0 %v116_v5  ;;  %v135_v12 = vsel %vm130_vm5, %v134_v11, 0.0  ;;  %vm151_vm7 = vcmp.eq.s32.totalorder %v411_v2, 5  ;;  %vm161_vm8 = vcmp.eq.s32.totalorder %v411_v2, 4 }
  0x1e   : > { %vm171_vm9 = vcmp.eq.s32.totalorder %v411_v2, 3  ;;  %vm181_vm10 = vcmp.eq.s32.totalorder %v411_v2, 2  ;;  %vm191_vm11 = vcmp.eq.s32.totalorder %v411_v2, 1  ;;  %vm200_vm12 = vcmp.eq.s32.totalorder %v411_v2, 0 }
  0xaa   : > { %v416_v7 = vpop.xlane.xlu0 %117 }
  0xab   : > { %347 = vrcp.f32 %v416_v7  ;;  %vm207_vm13 = vweird.f32 %v416_v7 }
  0xb5   : > { %v348_v8 = vpop.eup %347 }
  0xb6   : > { %v123_v9 = vmul.f32 %v348_v8, %v121_v6 }
  0xb8   : > { %124 = vst [vmem:[#allocation2] sm:$0xff] %v123_v9 }
  0xbf   : > { %v137_v13 = vld [vmem:[#allocation2 + $0x6] ss:$0 sm:$0xff]  ;;  %v147_v16 = vld [vmem:[#allocation2 + $0x5] ss:$0 sm:$0xff]  ;;  %v157_v21 = vld [vmem:[#allocation2 + $0x4] ss:$0 sm:$0xff] }
  0xc0   : > { %v138_v14 = vxor.u32 2147483648, %v137_v13  ;;  %v148_v18 = vxor.u32 2147483648, %v147_v16  ;;  %v158_v23 = vxor.u32 2147483648, %v157_v21  ;;  %v167_v26 = vld [vmem:[#allocation2 + $0x3] ss:$0 sm:$0xff] }
  0xc1   : > { %v168_v28 = vxor.u32 2147483648, %v167_v26  ;;  %v177_v31 = vld [vmem:[#allocation2 + $0x2] ss:$0 sm:$0xff]  ;;  %v187_v36 = vld [vmem:[#allocation2 + $0x1] ss:$0 sm:$0xff] }
  0xc2   : > { %v142_v15 = vmul.f32 %v138_v14, %v135_v12  ;;  %v178_v33 = vxor.u32 2147483648, %v177_v31  ;;  %v188_v38 = vxor.u32 2147483648, %v187_v36  ;;  %v196_v41 = vld [vmem:[#allocation2] ss:$0 sm:$0xff] }
  0xc3   : > { %v197_v43 = vxor.u32 2147483648, %v196_v41 }
  0xc4   : > { %143 = vadd.xlane.f32.xlu0 %v142_v15 }
 0x151   : > { %v144_v17 = vpop.xlane.xlu0 %143 }
 0x152   : > { %v145_v19 = vsel %vm141_vm6, %v144_v17, %v135_v12 }
 0x153   : > { %v152_v20 = vmul.f32 %v148_v18, %v145_v19 }
 0x155   : > { %153 = vadd.xlane.f32.xlu1 %v152_v20 }
 0x1e2   : > { %v154_v22 = vpop.xlane.xlu1 %153 }
 0x1e3   : > { %v155_v24 = vsel %vm151_vm7, %v154_v22, %v145_v19 }
 0x1e4   : > { %v162_v25 = vmul.f32 %v158_v23, %v155_v24 }
 0x1e6   : > { %163 = vadd.xlane.f32.xlu1 %v162_v25 }
 0x273   : > { %v164_v27 = vpop.xlane.xlu1 %163 }
 0x274   : > { %v165_v29 = vsel %vm161_vm8, %v164_v27, %v155_v24 }
 0x275   : > { %v172_v30 = vmul.f32 %v168_v28, %v165_v29 }
 0x277   : > { %173 = vadd.xlane.f32.xlu0 %v172_v30 }
 0x304   : > { %v174_v32 = vpop.xlane.xlu0 %173 }
 0x305   : > { %v175_v34 = vsel %vm171_vm9, %v174_v32, %v165_v29 }
 0x306   : > { %v182_v35 = vmul.f32 %v178_v33, %v175_v34 }
 0x308   : > { %183 = vadd.xlane.f32.xlu1 %v182_v35 }
 0x395   : > { %v184_v37 = vpop.xlane.xlu1 %183 }
 0x396   : > { %v185_v39 = vsel %vm181_vm10, %v184_v37, %v175_v34 }
 0x397   : > { %v192_v40 = vmul.f32 %v188_v38, %v185_v39 }
 0x399   : > { %193 = vadd.xlane.f32.xlu0 %v192_v40 }
 0x426   : > { %v194_v42 = vpop.xlane.xlu0 %193 }
 0x427   : > { %v195_v44 = vsel %vm191_vm11, %v194_v42, %v185_v39 }
 0x428   : > { %v201_v45 = vmul.f32 %v197_v43, %v195_v44 }
 0x42a   : > { %202 = vadd.xlane.f32.xlu1 %v201_v45 }
 0x4b7   : > { %v203_v46 = vpop.xlane.xlu1 %202 }
 0x4b8   : > { %v204_v47 = vsel %vm200_vm12, %v203_v46, %v195_v44 }
 0x4b9   : > { %v206_v48 = vmul.f32 %v348_v8, %v204_v47 }
 0x4bb   : > { %v208_v49 = vsel %vm207_vm13, %v204_v47, %v206_v48 }
 0x4bc   : > { %247 = vst [vmem:[%s218_s24] sm:$0xff] %v208_v49 }
 0x4bd PF: > { %s7_s8 = sadd.s32 1, %s371_s8   ;;  %s444_s6 = smov %s367_s7 }
 0x4be   : > { %p4_p5 = scmp.ge.s32.totalorder %s7_s8, 10   ;;  %s445_s7 = smov %s447_s10 }
 0x4c0   :  { %6 = sbr.rel (!%p4_p5) target bundleno = 2 (0x2), region = 124 }

// kernel: _lambda_.7
= control target key start
LH: loop header
LB: loop body
LE: loop exit
PB: predicated region body
PF: predicated region fallthrough
CT: control target
= control target key end

     0   :  { %vm35_vm0 = vcmask 64512   ;;  %v21_v6 = vlaneseq  ;;  %vm335_vm4 = vmmov 1   ;;  %vm125_vm8 = vcmask 130048   ;;  %s424_s2 = inlined_call_operand.vmem [shape: f32[8,16], index: 2, kind: input, shape index: {}]   ;;  %s425_s1 = inlined_call_operand.vmem [shape: f32[8,16], index: 1, kind: input, shape index: {}]   ;;  %s426_s0 = inlined_call_operand.vmem [shape: f32[16,8], index: 0, kind: input, shape index: {}]   ;;  %s427_s3 = inlined_call_operand.vmem [shape: f32[16,8], index: 3, kind: input, shape index: {}]   ;;  %s428_s4 = inlined_call_operand.vmem [shape: f32[1,128], index: 4, kind: output, shape index: {}]  }
   0x1   :  { %v20_v0 = vld [vmem:[%s424_s2] sm:$0xff]  ;;  %v18_v3 = vld [vmem:[%s426_s0 + $0x8] sm:$0xff] }
   0x2   :  { %v19_v1 = vld [vmem:[%s425_s1] sm:$0xff]  ;;  %138 = vxpose.xlu0.b32.start.end [1/1] (short) (narrow) %v20_v0, 16  ;;  %322 = vmatprep.subr.mxu1 %v20_v0  ;;  %v22_v7 = vshrl.u32 %v21_v6, 7  ;;  %v377_v9 = vand.u32 127, %v21_v6  ;;  %v272_v15 = vld [vmem:[%s427_s3 + $0x8] sm:$0xff] }
   0x3   :  { %v17_v2 = vld [vmem:[%s426_s0] sm:$0xff]  ;;  %317 = vmatprep.subr.mxu0 %v19_v1  ;;  %323 = vmatpush3.msra.mxu1 %v20_v0  ;;  %v274_v23 = vmul.f32 %v272_v15, %v18_v3 }
   0x4   :  { %318 = vmatpush3.msra.mxu0 %v19_v1  ;;  %319 = vmatprep.mubr.msk.f32.mxu0 %vm35_vm0, %v17_v2  ;;  %v23_v8 = vadd.s32 8, %v22_v7  ;;  %vm26_vm2 = vcmp.eq.s32.totalorder %v22_v7, %v377_v9  ;;  %vm30_vm3 = vcmp.lt.s32.totalorder %v377_v9, 8  ;;  %v271_v14 = vld [vmem:[%s427_s3] sm:$0xff]  ;;  %vm291_vm9 = vcmp.eq.s32.totalorder %v377_v9, 2 }
   0x5   :  { %320 = vmatmul.mubr.msk.f32.vlgmr.msra.gmra.mrb[0].mxu0 %vm35_vm0, %v18_v3  ;;  %vm31_vm5 = vmxor %vm335_vm4, %vm30_vm3  ;;  %v273_v22 = vmul.f32 %v271_v14, %v17_v2  ;;  %v276_v30 = vmul.f32 %v274_v23, %v274_v23  ;;  %vm290_vm10 = vcmp.eq.s32.totalorder %v377_v9, 1  ;;  %vm289_vm11 = vcmp.eq.s32.totalorder %v377_v9, 0 }
   0x6   :  { %vm27_vm1 = vcmp.eq.s32.totalorder %v23_v8, %v377_v9  ;;  %vm392_vm6 = vmxor %vm31_vm5, %vm335_vm4 }
   0x7   :  { %vm396_vm7 = vmxor %vm30_vm3, %vm335_vm4  ;;  %v275_v29 = vmul.f32 %v273_v22, %v273_v22  ;;  %v278_v32 = vsel %vm35_vm0, %v276_v30, 0.0 }
   0x9   :  { %v277_v31 = vsel %vm35_vm0, %v275_v29, 0.0 }
   0xa   :  { %v279_v33 = vadd.f32 %v278_v32, %v277_v31 }
  0x82   :  { %v154_v4 = vpop.trf.xlu0 }
  0x83   :  { %324 = vmatprep.mubr.msk.f32.mxu1 %vm35_vm0, %v154_v4 }
  0x86   :  { %v155_v5 = vpop.trf.xlu0 }
  0x87   :  { %325 = vmatmul.mubr.msk.f32.vlgmr.msra.gmra.mrb[0].mxu1 %vm35_vm0, %v155_v5 }
  0xd8   :  { %v321_v10 = vpop.f32.mrb[0].mxu0 }
  0xd9   :  { %v306_v11 = vadd.f32 -1.0, %v321_v10  ;;  %v108_v12 = vpop.f32.mrb[1].mxu0 }
  0xda   :  { %v305_v13 = vadd.f32 -1.0, %v108_v12 }
  0xdb   :  { %v120_v16 = vsel %vm27_vm1, %v306_v11, %v321_v10 }
  0xdc   :  { %v122_v17 = vmul.f32 %v120_v16, %v120_v16  ;;  %v119_v18 = vsel %vm26_vm2, %v305_v13, %v108_v12 }
  0xdd   :  { %v121_v20 = vmul.f32 %v119_v18, %v119_v18 }
  0xde   :  { %v124_v24 = vsel %vm396_vm7, %v122_v17, 0.0 }
  0xdf   :  { %v123_v25 = vsel %vm392_vm6, %v121_v20, 0.0  ;;  %v127_v26 = vsel %vm125_vm8, %v124_v24, 0.0 }
  0xe0   :  { %v126_v27 = vsel %vm125_vm8, %v123_v25, 0.0 }
  0xe1   :  { %v128_v28 = vadd.f32 %v127_v26, %v126_v27 }
  0xe3   :  { %129 = vadd.xlane.f32.xlu0 %v128_v28 }
 0x15a   :  { %v326_v34 = vpop.f32.mrb[0].mxu1 }
 0x15b   :  { %v310_v35 = vadd.f32 -1.0, %v326_v34  ;;  %v242_v36 = vpop.f32.mrb[1].mxu1 }
 0x15c   :  { %v309_v37 = vadd.f32 -1.0, %v242_v36 }
 0x15d   :  { %v254_v38 = vsel %vm27_vm1, %v310_v35, %v326_v34 }
 0x15e   :  { %v256_v39 = vmul.f32 %v254_v38, %v254_v38  ;;  %v253_v40 = vsel %vm26_vm2, %v309_v37, %v242_v36 }
 0x15f   :  { %v255_v41 = vmul.f32 %v253_v40, %v253_v40 }
 0x160   :  { %v258_v42 = vsel %vm396_vm7, %v256_v39, 0.0 }
 0x161   :  { %v257_v43 = vsel %vm392_vm6, %v255_v41, 0.0  ;;  %v260_v44 = vsel %vm125_vm8, %v258_v42, 0.0 }
 0x162   :  { %v259_v45 = vsel %vm125_vm8, %v257_v43, 0.0 }
 0x163   :  { %v261_v46 = vadd.f32 %v260_v44, %v259_v45 }
 0x165   :  { %262 = vadd.xlane.f32.xlu1 %v261_v46 }
 0x169   :  { %280 = vadd.xlane.f32.xlu1 %v279_v33 }
 0x170   :  { %v130_v47 = vpop.xlane.xlu0 %129 }
 0x171   :  { %v131_v48 = vrot.slane %v130_v47, 4 }
 0x173   :  { %v132_v49 = vadd.f32 %v131_v48, %v130_v47 }
 0x175   :  { %v133_v50 = vrot.slane %v132_v49, 2 }
 0x177   :  { %v134_v51 = vadd.f32 %v133_v50, %v132_v49 }
 0x179   :  { %v135_v52 = vrot.slane %v134_v51, 1 }
 0x17b   :  { %v136_v53 = vadd.f32 %v135_v52, %v134_v51 }
 0x17d   :  { %327 = vpush %v136_v53 }
 0x1ae   :  { %s328_s3 = spop %327 }
 0x1af   :  { %v296_v7 = vstv %s328_s3 }
 0x1f2   :  { %v263_v54 = vpop.xlane.xlu1 %262 }
 0x1f3   :  { %v264_v55 = vrot.slane %v263_v54, 4 }
 0x1f5   :  { %v265_v56 = vadd.f32 %v264_v55, %v263_v54 }
 0x1f6   :  { %v281_v57 = vpop.xlane.xlu1 %280 }
 0x1f7   :  { %v266_v58 = vrot.slane %v265_v56, 2  ;;  %v282_v59 = vrot.slane %v281_v57, 4 }
 0x1f9   :  { %v283_v60 = vadd.f32 %v282_v59, %v281_v57  ;;  %v267_v61 = vadd.f32 %v266_v58, %v265_v56 }
 0x1fb   :  { %v284_v62 = vrot.slane %v283_v60, 2  ;;  %v268_v63 = vrot.slane %v267_v61, 1 }
 0x1fd   :  { %v285_v0 = vadd.f32 %v284_v62, %v283_v60  ;;  %v269_v1 = vadd.f32 %v268_v63, %v267_v61 }
 0x1ff   :  { %329 = vpush %v269_v1  ;;  %v286_v2 = vrot.slane %v285_v0, 1 }
 0x201   :  { %v287_v3 = vadd.f32 %v286_v2, %v285_v0 }
 0x203   :  { %331 = vpush %v287_v3 }
 0x230   :  { %s330_s24 = spop %329 }
 0x231   :  { %v294_v5 = vstv %s330_s24 }
 0x234   :  { %s332_s25 = spop %331 }
 0x235   :  { %v292_v4 = vstv %s332_s25 }
 0x236   :  { %v293_v6 = vsel %vm291_vm9, %v292_v4, 0.0 }
 0x237   :  { %v295_v8 = vsel %vm290_vm10, %v294_v5, %v293_v6 }
 0x238   :  { %v297_v10 = vsel %vm289_vm11, %v296_v7, %v295_v8 }
 0x239   :  { %298 = vst [vmem:[%s428_s4] sm:$0x1] %v297_v10 }

</bundles_post_ra>
